<compile_context>
chip_gen: v6e
topology: v6e:2x2x1
jax: 0.10.0
libtpu: 0.0.40
codegen_flags: <defaults>
</compile_context>

<pallas_src>
import functools

import jax
import jax.numpy as jnp
from jax.experimental import pallas as pl
from jax.experimental.pallas import tpu as pltpu


# ----------------------------- Pallas kernel --------------------------------

def lantern_kernel(depths, matmul_dtype,
                   o_ref, d_ref, w1_ref, b1_ref, w2_ref, b2_ref, w3_ref, b3_ref,
                   disp_ref):
    """One lane-tile of rays: fused point-gen + density MLP + probabilistic raymarch.

    o_ref, d_ref : (3, T)  per-ray origin / direction columns
    w1_ref       : (H, 3)  W1^T
    b1_ref       : (H, 1)
    w2_ref       : (H, H)  W2^T
    b2_ref       : (H, 1)
    w3_ref       : (H, 1)  w3 column (head weights)
    b3_ref       : (1,)    scalar in SMEM
    disp_ref     : (1, T)  lane-dense disparity output
    """
    o = o_ref[...]                                   # (3, T)
    d = d_ref[...]                                   # (3, T)
    w1 = w1_ref[...]                                 # (H, 3)
    b1 = b1_ref[...]                                 # (H, 1)
    w2 = w2_ref[...].astype(matmul_dtype)            # (H, H)   (hoisted out of loop)
    b2 = b2_ref[...]                                 # (H, 1)
    w3 = w3_ref[...]                                 # (H, 1)
    b3 = b3_ref[0]                                   # scalar

    # Layer-1 affine pieces (sample independent):
    #   h1_pre(s) = W1^T (o + depth_s * dir) + b1 = a + depth_s * b
    # K=3 contraction -> three broadcast FMAs on the VPU (no MXU round trip).
    a = b1
    b = jnp.zeros_like(b1)
    for j in range(3):
        a = a + w1[:, j:j + 1] * o[j:j + 1, :]       # (H,1)*(1,T) -> (H,T)
        b = b + w1[:, j:j + 1] * d[j:j + 1, :]

    # Online-over-samples: fold each depth's densities straight into running
    # online-softmax accumulators (peak live intermediate ~O(H*T), not O(H*S*T)).
    m = denom = num = None
    for s, depth in enumerate(depths):
        h1 = jnp.maximum(a + depth * b, 0.0)                             # (H, T)
        h2 = jnp.maximum(
            jnp.dot(w2, h1.astype(matmul_dtype),
                    preferred_element_type=jnp.float32) + b2, 0.0)        # (H, T)  MXU
        # 1-wide head: VPU multiply + cross-sublane (XLU) reduce, not an M=1 matmul.
        z = jnp.sum(w3 * h2, axis=0, keepdims=True) + b3                  # (1, T)
        # numerically safe softplus -> non-negative densities
        sigma = jnp.maximum(z, 0.0) + jnp.log1p(jnp.exp(-jnp.abs(z)))
        if s == 0:
            m = sigma
            denom = jnp.ones_like(sigma)
            num = depth * jnp.ones_like(sigma)
        else:
            m_new = jnp.maximum(m, sigma)
            alpha = jnp.exp(m - m_new)
            e = jnp.exp(sigma - m_new)
            denom = alpha * denom + e
            num = alpha * num + depth * e
            m = m_new

    # rendered_disparity = 1 / E[depth] = sum(e) / sum(depth * e)
    disp_ref[...] = denom * pl.reciprocal(num, approx=False)


def render_disparity(origins, dirs, params, depth_values, *,
                     tile_rays=None, matmul_dtype=jnp.float32):
    """origins/dirs: (N, 3) f32 per ray -> disparity (1, N) f32."""
    N = origins.shape[0]
    H = params["w1"].shape[1]
    if tile_rays is None:
        # Two wide grid steps (one per v7x TensorCore); cap for VMEM headroom at scale.
        tile_rays = max(128, min(2048, N // 2))
    assert N % tile_rays == 0 and tile_rays % 128 == 0

    # Rays on the lane axis; weights pre-transposed once on the host side.
    o_t = origins.T.astype(jnp.float32)                 # (3, N)
    d_t = dirs.T.astype(jnp.float32)                    # (3, N)
    w1t = params["w1"].T                                 # (H, 3)
    b1c = params["b1"].T                                 # (H, 1)
    w2t = params["w2"].T                                 # (H, H)
    b2c = params["b2"].T                                 # (H, 1)
    w3c = params["w3"]                                   # (H, 1)
    b3s = params["b3"].reshape(1)                        # (1,)

    full = lambda i: (0, 0)
    kernel = functools.partial(
        lantern_kernel, tuple(float(v) for v in depth_values), matmul_dtype)
    return pl.pallas_call(
        kernel,
        out_shape=jax.ShapeDtypeStruct((1, N), jnp.float32),
        grid=(N // tile_rays,),
        in_specs=[
            pl.BlockSpec((3, tile_rays), lambda i: (0, i)),       # origins
            pl.BlockSpec((3, tile_rays), lambda i: (0, i)),       # directions
            pl.BlockSpec((H, 3), full),                           # W1^T
            pl.BlockSpec((H, 1), full),                           # b1 column
            pl.BlockSpec((H, H), full),                           # W2^T
            pl.BlockSpec((H, 1), full),                           # b2 column
            pl.BlockSpec((H, 1), full),                           # w3 column
            pl.BlockSpec(memory_space=pltpu.MemorySpace.SMEM),    # b3 scalar
        ],
        out_specs=pl.BlockSpec((1, tile_rays), lambda i: (0, i)),
        compiler_params=pltpu.CompilerParams(dimension_semantics=("parallel",)),
    )(o_t, d_t, w1t, b1c, w2t, b2c, w3c, b3s)


# ------------------------------ JAX glue -------------------------------------

def monte_carlo_raysampler(key, Rmat, Tvec, focal, principal, num_rays):
    """Training-mode (Monte Carlo) ray sampler: per-ray world origins + directions.

    Pinhole camera, row-vector convention: world = cam @ R^T, camera center = -T @ R^T.
    (Exact PyTorch3D camera semantics are not recoverable from the snippet; this is a
    faithful pinhole reconstruction.)
    """
    B = Rmat.shape[0]
    kx, ky = jax.random.split(key)
    x = jax.random.uniform(kx, (B, num_rays), minval=-1.0, maxval=1.0)
    y = jax.random.uniform(ky, (B, num_rays), minval=-1.0, maxval=1.0)
    px, py = principal
    dirs_cam = jnp.stack(
        [(x - px) / focal, (y - py) / focal, jnp.ones_like(x)], axis=-1)   # (B, R, 3)
    R_t = jnp.transpose(Rmat, (0, 2, 1))
    dirs_world = jnp.einsum("brj,bjk->brk", dirs_cam, R_t)                 # (B, R, 3)
    origins = -jnp.einsum("bj,bjk->bk", Tvec, R_t)                         # (B, 3)
    origins = jnp.broadcast_to(origins[:, None, :], dirs_world.shape)
    return origins.astype(jnp.float32), dirs_world.astype(jnp.float32)


def init_params(key, hidden):
    ks = jax.random.split(key, 3)
    return {
        "w1": jax.random.normal(ks[0], (3, hidden), jnp.float32) * 0.5,
        "b1": jnp.zeros((1, hidden), jnp.float32),
        "w2": jax.random.normal(ks[1], (hidden, hidden), jnp.float32) * 0.2,
        "b2": jnp.zeros((1, hidden), jnp.float32),
        "w3": jax.random.normal(ks[2], (hidden, 1), jnp.float32) * 0.2,
        "b3": jnp.zeros((1, 1), jnp.float32),
    }


def reference_disparity(origins, dirs, depth_values, params):
    """Pure-JAX reference of the fused sampler+MLP+raymarcher math."""
    depths = jnp.asarray(depth_values, jnp.float32)                         # (S,)
    points = origins[..., None, :] + depths[..., None] * dirs[..., None, :]  # (B,R,S,3)
    h = jax.nn.relu(points @ params["w1"] + params["b1"])
    h = jax.nn.relu(h @ params["w2"] + params["b2"])
    sigma = jax.nn.softplus(h @ params["w3"] + params["b3"])[..., 0]        # (B,R,S)
    w = jax.nn.softmax(sigma, axis=-1)
    d = jnp.sum(w * depths, axis=-1, keepdims=True)
    return 1.0 / d


# --------------------------------- main --------------------------------------

if __name__ == "__main__":
    # Lantern(image_size=(16,16), num_samples_per_ray=8, num_rays_per_image=256,
    #         min_depth=0.5, max_depth=4.0)  -- training (Monte Carlo) mode.
    B = 2
    num_rays = 256
    S = 8
    min_depth, max_depth = 0.5, 4.0
    hidden = 32
    focal = 10.0
    principal = (0.0, 0.0)

    key = jax.random.PRNGKey(0)
    k_cam, k_ray, k_w = jax.random.split(key, 3)

    # LanternInput: R (B,3,3), T (B,3)
    Rmat = jnp.broadcast_to(jnp.eye(3, dtype=jnp.float32), (B, 3, 3))
    Tvec = jax.random.normal(k_cam, (B, 3), dtype=jnp.float32) * 0.1

    params = init_params(k_w, hidden)
    origins, dirs = monte_carlo_raysampler(
        k_ray, Rmat, Tvec, focal, principal, num_rays)

    # Static ray-sample depths (identical for every ray) baked into the kernel.
    depth_values = tuple(
        min_depth + i * (max_depth - min_depth) / (S - 1) for i in range(S))

    N = B * num_rays
    disp = render_disparity(origins.reshape(N, 3), dirs.reshape(N, 3),
                            params, depth_values)
    rendered_disparity = disp.reshape(B, num_rays, 1)   # (batch, num_rays, channels)
    jax.block_until_ready(rendered_disparity)

    ref = reference_disparity(origins, dirs, depth_values, params)
    assert rendered_disparity.shape == (B, num_rays, 1)
    assert jnp.allclose(rendered_disparity, ref, atol=1e-4, rtol=1e-4)

    print("KERNEL_OK")
</pallas_src>

<mosaic_0001>
module attributes {stable_mosaic.version = 11 : i64} {
  func.func @lantern_kernel(%arg0: i32, %arg1: memref<3x256xf32, #tpu.memory_space<vmem>>, %arg2: memref<3x256xf32, #tpu.memory_space<vmem>>, %arg3: memref<32x3xf32, #tpu.memory_space<vmem>>, %arg4: memref<32x1xf32, #tpu.memory_space<vmem>>, %arg5: memref<32x32xf32, #tpu.memory_space<vmem>>, %arg6: memref<32x1xf32, #tpu.memory_space<vmem>>, %arg7: memref<32x1xf32, #tpu.memory_space<vmem>>, %arg8: memref<1xf32, #tpu.memory_space<smem>>, %arg9: memref<1x256xf32, #tpu.memory_space<vmem>>) attributes {dimension_semantics = [#tpu.dimension_semantics<parallel>], iteration_bounds = array<i64: 2>, scalar_prefetch = 0 : i64, scratch_operands = 0 : i64, tpu.core_type = #tpu.core_type<tc>, window_params = [{transform_indices = @transform_0, window_bounds = array<i64: 3, 256>}, {transform_indices = @transform_1, window_bounds = array<i64: 3, 256>}, {pipeline_mode = #tpu.pipeline_mode<synchronous>, transform_indices = @transform_2, window_bounds = array<i64: 32, 3>}, {pipeline_mode = #tpu.pipeline_mode<synchronous>, transform_indices = @transform_3, window_bounds = array<i64: 32, 1>}, {pipeline_mode = #tpu.pipeline_mode<synchronous>, transform_indices = @transform_4, window_bounds = array<i64: 32, 32>}, {pipeline_mode = #tpu.pipeline_mode<synchronous>, transform_indices = @transform_5, window_bounds = array<i64: 32, 1>}, {pipeline_mode = #tpu.pipeline_mode<synchronous>, transform_indices = @transform_6, window_bounds = array<i64: 32, 1>}, {transform_indices = @transform_7, window_bounds = array<i64: 1>}, {transform_indices = @transform_8, window_bounds = array<i64: 1, 256>}]} {
    %c0 = arith.constant 0 : index
    %c0_0 = arith.constant 0 : index
    %0 = vector.load %arg1[%c0, %c0_0] : memref<3x256xf32, #tpu.memory_space<vmem>>, vector<3x256xf32>
    %c0_1 = arith.constant 0 : index
    %c0_2 = arith.constant 0 : index
    %1 = vector.load %arg2[%c0_1, %c0_2] : memref<3x256xf32, #tpu.memory_space<vmem>>, vector<3x256xf32>
    %c0_3 = arith.constant 0 : index
    %c0_4 = arith.constant 0 : index
    %2 = vector.load %arg3[%c0_3, %c0_4] : memref<32x3xf32, #tpu.memory_space<vmem>>, vector<32x3xf32>
    %c0_5 = arith.constant 0 : index
    %c0_6 = arith.constant 0 : index
    %3 = vector.load %arg4[%c0_5, %c0_6] : memref<32x1xf32, #tpu.memory_space<vmem>>, vector<32x1xf32>
    %c0_7 = arith.constant 0 : index
    %c0_8 = arith.constant 0 : index
    %4 = vector.load %arg5[%c0_7, %c0_8] : memref<32x32xf32, #tpu.memory_space<vmem>>, vector<32x32xf32>
    %c0_9 = arith.constant 0 : index
    %c0_10 = arith.constant 0 : index
    %5 = vector.load %arg6[%c0_9, %c0_10] : memref<32x1xf32, #tpu.memory_space<vmem>>, vector<32x1xf32>
    %c0_11 = arith.constant 0 : index
    %c0_12 = arith.constant 0 : index
    %6 = vector.load %arg7[%c0_11, %c0_12] : memref<32x1xf32, #tpu.memory_space<vmem>>, vector<32x1xf32>
    %c0_13 = arith.constant 0 : index
    %7 = memref.load %arg8[%c0_13] : memref<1xf32, #tpu.memory_space<smem>>
    %cst = arith.constant 0.000000e+00 : f32
    %8 = vector.broadcast %cst : f32 to vector<32x1xf32>
    %9 = vector.extract_strided_slice %2 {offsets = [0, 0], sizes = [32, 1], strides = [1, 1]} : vector<32x3xf32> to vector<32x1xf32>
    %10 = vector.extract_strided_slice %0 {offsets = [0, 0], sizes = [1, 256], strides = [1, 1]} : vector<3x256xf32> to vector<1x256xf32>
    %11 = vector.broadcast %9 : vector<32x1xf32> to vector<32x256xf32>
    %12 = vector.broadcast %10 : vector<1x256xf32> to vector<32x256xf32>
    %13 = arith.mulf %11, %12 : vector<32x256xf32>
    %14 = vector.broadcast %3 : vector<32x1xf32> to vector<32x256xf32>
    %15 = arith.addf %14, %13 : vector<32x256xf32>
    %16 = vector.extract_strided_slice %2 {offsets = [0, 0], sizes = [32, 1], strides = [1, 1]} : vector<32x3xf32> to vector<32x1xf32>
    %17 = vector.extract_strided_slice %1 {offsets = [0, 0], sizes = [1, 256], strides = [1, 1]} : vector<3x256xf32> to vector<1x256xf32>
    %18 = vector.broadcast %16 : vector<32x1xf32> to vector<32x256xf32>
    %19 = vector.broadcast %17 : vector<1x256xf32> to vector<32x256xf32>
    %20 = arith.mulf %18, %19 : vector<32x256xf32>
    %21 = vector.broadcast %8 : vector<32x1xf32> to vector<32x256xf32>
    %22 = arith.addf %21, %20 : vector<32x256xf32>
    %23 = vector.extract_strided_slice %2 {offsets = [0, 1], sizes = [32, 1], strides = [1, 1]} : vector<32x3xf32> to vector<32x1xf32>
    %24 = vector.extract_strided_slice %0 {offsets = [1, 0], sizes = [1, 256], strides = [1, 1]} : vector<3x256xf32> to vector<1x256xf32>
    %25 = vector.broadcast %23 : vector<32x1xf32> to vector<32x256xf32>
    %26 = vector.broadcast %24 : vector<1x256xf32> to vector<32x256xf32>
    %27 = arith.mulf %25, %26 : vector<32x256xf32>
    %28 = arith.addf %15, %27 : vector<32x256xf32>
    %29 = vector.extract_strided_slice %2 {offsets = [0, 1], sizes = [32, 1], strides = [1, 1]} : vector<32x3xf32> to vector<32x1xf32>
    %30 = vector.extract_strided_slice %1 {offsets = [1, 0], sizes = [1, 256], strides = [1, 1]} : vector<3x256xf32> to vector<1x256xf32>
    %31 = vector.broadcast %29 : vector<32x1xf32> to vector<32x256xf32>
    %32 = vector.broadcast %30 : vector<1x256xf32> to vector<32x256xf32>
    %33 = arith.mulf %31, %32 : vector<32x256xf32>
    %34 = arith.addf %22, %33 : vector<32x256xf32>
    %35 = vector.extract_strided_slice %2 {offsets = [0, 2], sizes = [32, 1], strides = [1, 1]} : vector<32x3xf32> to vector<32x1xf32>
    %36 = vector.extract_strided_slice %0 {offsets = [2, 0], sizes = [1, 256], strides = [1, 1]} : vector<3x256xf32> to vector<1x256xf32>
    %37 = vector.broadcast %35 : vector<32x1xf32> to vector<32x256xf32>
    %38 = vector.broadcast %36 : vector<1x256xf32> to vector<32x256xf32>
    %39 = arith.mulf %37, %38 : vector<32x256xf32>
    %40 = arith.addf %28, %39 : vector<32x256xf32>
    %41 = vector.extract_strided_slice %2 {offsets = [0, 2], sizes = [32, 1], strides = [1, 1]} : vector<32x3xf32> to vector<32x1xf32>
    %42 = vector.extract_strided_slice %1 {offsets = [2, 0], sizes = [1, 256], strides = [1, 1]} : vector<3x256xf32> to vector<1x256xf32>
    %43 = vector.broadcast %41 : vector<32x1xf32> to vector<32x256xf32>
    %44 = vector.broadcast %42 : vector<1x256xf32> to vector<32x256xf32>
    %45 = arith.mulf %43, %44 : vector<32x256xf32>
    %46 = arith.addf %34, %45 : vector<32x256xf32>
    %cst_14 = arith.constant 5.000000e-01 : f32
    %47 = vector.broadcast %cst_14 : f32 to vector<32x256xf32>
    %48 = arith.mulf %47, %46 : vector<32x256xf32>
    %49 = arith.addf %40, %48 : vector<32x256xf32>
    %cst_15 = arith.constant 0.000000e+00 : f32
    %50 = vector.broadcast %cst_15 : f32 to vector<32x256xf32>
    %51 = arith.maximumf %49, %50 : vector<32x256xf32>
    %cst_16 = arith.constant dense<0.000000e+00> : vector<32x256xf32>
    %52 = tpu.matmul %4, %51, %cst_16 {dimension_numbers = #tpu.dot_dimension_numbers<[1], [0], [0], [1], [0, 0, 1, 1], [], []>} : vector<32x32xf32>, vector<32x256xf32>, vector<32x256xf32> -> vector<32x256xf32>
    %53 = vector.broadcast %5 : vector<32x1xf32> to vector<32x256xf32>
    %54 = arith.addf %52, %53 : vector<32x256xf32>
    %cst_17 = arith.constant 0.000000e+00 : f32
    %55 = vector.broadcast %cst_17 : f32 to vector<32x256xf32>
    %56 = arith.maximumf %54, %55 : vector<32x256xf32>
    %57 = vector.broadcast %6 : vector<32x1xf32> to vector<32x256xf32>
    %58 = arith.mulf %57, %56 : vector<32x256xf32>
    %cst_18 = arith.constant dense<0.000000e+00> : vector<256xf32>
    %59 = vector.multi_reduction <add>, %58, %cst_18 [0] : vector<32x256xf32> to vector<256xf32>
    %60 = vector.shape_cast %59 : vector<256xf32> to vector<1x256xf32>
    %61 = vector.broadcast %7 : f32 to vector<1x256xf32>
    %62 = arith.addf %60, %61 : vector<1x256xf32>
    %cst_19 = arith.constant 0.000000e+00 : f32
    %63 = vector.broadcast %cst_19 : f32 to vector<1x256xf32>
    %64 = arith.maximumf %62, %63 : vector<1x256xf32>
    %65 = math.absf %62 : vector<1x256xf32>
    %cst_20 = arith.constant 0.000000e+00 : f32
    %66 = vector.broadcast %cst_20 : f32 to vector<1x256xf32>
    %67 = arith.subf %66, %65 : vector<1x256xf32>
    %68 = math.exp %67 : vector<1x256xf32>
    %69 = math.log1p %68 : vector<1x256xf32>
    %70 = arith.addf %64, %69 : vector<1x256xf32>
    %cst_21 = arith.constant 1.000000e+00 : f32
    %71 = vector.broadcast %cst_21 : f32 to vector<1x256xf32>
    %cst_22 = arith.constant 1.000000e+00 : f32
    %72 = vector.broadcast %cst_22 : f32 to vector<1x256xf32>
    %cst_23 = arith.constant 5.000000e-01 : f32
    %73 = vector.broadcast %cst_23 : f32 to vector<1x256xf32>
    %74 = arith.mulf %73, %72 : vector<1x256xf32>
    %cst_24 = arith.constant 1.000000e+00 : f32
    %75 = vector.broadcast %cst_24 : f32 to vector<32x256xf32>
    %76 = arith.mulf %75, %46 : vector<32x256xf32>
    %77 = arith.addf %40, %76 : vector<32x256xf32>
    %cst_25 = arith.constant 0.000000e+00 : f32
    %78 = vector.broadcast %cst_25 : f32 to vector<32x256xf32>
    %79 = arith.maximumf %77, %78 : vector<32x256xf32>
    %cst_26 = arith.constant dense<0.000000e+00> : vector<32x256xf32>
    %80 = tpu.matmul %4, %79, %cst_26 {dimension_numbers = #tpu.dot_dimension_numbers<[1], [0], [0], [1], [0, 0, 1, 1], [], []>} : vector<32x32xf32>, vector<32x256xf32>, vector<32x256xf32> -> vector<32x256xf32>
    %81 = vector.broadcast %5 : vector<32x1xf32> to vector<32x256xf32>
    %82 = arith.addf %80, %81 : vector<32x256xf32>
    %cst_27 = arith.constant 0.000000e+00 : f32
    %83 = vector.broadcast %cst_27 : f32 to vector<32x256xf32>
    %84 = arith.maximumf %82, %83 : vector<32x256xf32>
    %85 = vector.broadcast %6 : vector<32x1xf32> to vector<32x256xf32>
    %86 = arith.mulf %85, %84 : vector<32x256xf32>
    %cst_28 = arith.constant dense<0.000000e+00> : vector<256xf32>
    %87 = vector.multi_reduction <add>, %86, %cst_28 [0] : vector<32x256xf32> to vector<256xf32>
    %88 = vector.shape_cast %87 : vector<256xf32> to vector<1x256xf32>
    %89 = vector.broadcast %7 : f32 to vector<1x256xf32>
    %90 = arith.addf %88, %89 : vector<1x256xf32>
    %cst_29 = arith.constant 0.000000e+00 : f32
    %91 = vector.broadcast %cst_29 : f32 to vector<1x256xf32>
    %92 = arith.maximumf %90, %91 : vector<1x256xf32>
    %93 = math.absf %90 : vector<1x256xf32>
    %cst_30 = arith.constant 0.000000e+00 : f32
    %94 = vector.broadcast %cst_30 : f32 to vector<1x256xf32>
    %95 = arith.subf %94, %93 : vector<1x256xf32>
    %96 = math.exp %95 : vector<1x256xf32>
    %97 = math.log1p %96 : vector<1x256xf32>
    %98 = arith.addf %92, %97 : vector<1x256xf32>
    %99 = arith.maximumf %70, %98 : vector<1x256xf32>
    %100 = arith.subf %70, %99 : vector<1x256xf32>
    %101 = math.exp %100 : vector<1x256xf32>
    %102 = arith.subf %98, %99 : vector<1x256xf32>
    %103 = math.exp %102 : vector<1x256xf32>
    %104 = arith.mulf %101, %71 : vector<1x256xf32>
    %105 = arith.addf %104, %103 : vector<1x256xf32>
    %106 = arith.mulf %101, %74 : vector<1x256xf32>
    %cst_31 = arith.constant 1.000000e+00 : f32
    %107 = vector.broadcast %cst_31 : f32 to vector<1x256xf32>
    %108 = arith.mulf %107, %103 : vector<1x256xf32>
    %109 = arith.addf %106, %108 : vector<1x256xf32>
    %cst_32 = arith.constant 1.500000e+00 : f32
    %110 = vector.broadcast %cst_32 : f32 to vector<32x256xf32>
    %111 = arith.mulf %110, %46 : vector<32x256xf32>
    %112 = arith.addf %40, %111 : vector<32x256xf32>
    %cst_33 = arith.constant 0.000000e+00 : f32
    %113 = vector.broadcast %cst_33 : f32 to vector<32x256xf32>
    %114 = arith.maximumf %112, %113 : vector<32x256xf32>
    %cst_34 = arith.constant dense<0.000000e+00> : vector<32x256xf32>
    %115 = tpu.matmul %4, %114, %cst_34 {dimension_numbers = #tpu.dot_dimension_numbers<[1], [0], [0], [1], [0, 0, 1, 1], [], []>} : vector<32x32xf32>, vector<32x256xf32>, vector<32x256xf32> -> vector<32x256xf32>
    %116 = vector.broadcast %5 : vector<32x1xf32> to vector<32x256xf32>
    %117 = arith.addf %115, %116 : vector<32x256xf32>
    %cst_35 = arith.constant 0.000000e+00 : f32
    %118 = vector.broadcast %cst_35 : f32 to vector<32x256xf32>
    %119 = arith.maximumf %117, %118 : vector<32x256xf32>
    %120 = vector.broadcast %6 : vector<32x1xf32> to vector<32x256xf32>
    %121 = arith.mulf %120, %119 : vector<32x256xf32>
    %cst_36 = arith.constant dense<0.000000e+00> : vector<256xf32>
    %122 = vector.multi_reduction <add>, %121, %cst_36 [0] : vector<32x256xf32> to vector<256xf32>
    %123 = vector.shape_cast %122 : vector<256xf32> to vector<1x256xf32>
    %124 = vector.broadcast %7 : f32 to vector<1x256xf32>
    %125 = arith.addf %123, %124 : vector<1x256xf32>
    %cst_37 = arith.constant 0.000000e+00 : f32
    %126 = vector.broadcast %cst_37 : f32 to vector<1x256xf32>
    %127 = arith.maximumf %125, %126 : vector<1x256xf32>
    %128 = math.absf %125 : vector<1x256xf32>
    %cst_38 = arith.constant 0.000000e+00 : f32
    %129 = vector.broadcast %cst_38 : f32 to vector<1x256xf32>
    %130 = arith.subf %129, %128 : vector<1x256xf32>
    %131 = math.exp %130 : vector<1x256xf32>
    %132 = math.log1p %131 : vector<1x256xf32>
    %133 = arith.addf %127, %132 : vector<1x256xf32>
    %134 = arith.maximumf %99, %133 : vector<1x256xf32>
    %135 = arith.subf %99, %134 : vector<1x256xf32>
    %136 = math.exp %135 : vector<1x256xf32>
    %137 = arith.subf %133, %134 : vector<1x256xf32>
    %138 = math.exp %137 : vector<1x256xf32>
    %139 = arith.mulf %136, %105 : vector<1x256xf32>
    %140 = arith.addf %139, %138 : vector<1x256xf32>
    %141 = arith.mulf %136, %109 : vector<1x256xf32>
    %cst_39 = arith.constant 1.500000e+00 : f32
    %142 = vector.broadcast %cst_39 : f32 to vector<1x256xf32>
    %143 = arith.mulf %142, %138 : vector<1x256xf32>
    %144 = arith.addf %141, %143 : vector<1x256xf32>
    %cst_40 = arith.constant 2.000000e+00 : f32
    %145 = vector.broadcast %cst_40 : f32 to vector<32x256xf32>
    %146 = arith.mulf %145, %46 : vector<32x256xf32>
    %147 = arith.addf %40, %146 : vector<32x256xf32>
    %cst_41 = arith.constant 0.000000e+00 : f32
    %148 = vector.broadcast %cst_41 : f32 to vector<32x256xf32>
    %149 = arith.maximumf %147, %148 : vector<32x256xf32>
    %cst_42 = arith.constant dense<0.000000e+00> : vector<32x256xf32>
    %150 = tpu.matmul %4, %149, %cst_42 {dimension_numbers = #tpu.dot_dimension_numbers<[1], [0], [0], [1], [0, 0, 1, 1], [], []>} : vector<32x32xf32>, vector<32x256xf32>, vector<32x256xf32> -> vector<32x256xf32>
    %151 = vector.broadcast %5 : vector<32x1xf32> to vector<32x256xf32>
    %152 = arith.addf %150, %151 : vector<32x256xf32>
    %cst_43 = arith.constant 0.000000e+00 : f32
    %153 = vector.broadcast %cst_43 : f32 to vector<32x256xf32>
    %154 = arith.maximumf %152, %153 : vector<32x256xf32>
    %155 = vector.broadcast %6 : vector<32x1xf32> to vector<32x256xf32>
    %156 = arith.mulf %155, %154 : vector<32x256xf32>
    %cst_44 = arith.constant dense<0.000000e+00> : vector<256xf32>
    %157 = vector.multi_reduction <add>, %156, %cst_44 [0] : vector<32x256xf32> to vector<256xf32>
    %158 = vector.shape_cast %157 : vector<256xf32> to vector<1x256xf32>
    %159 = vector.broadcast %7 : f32 to vector<1x256xf32>
    %160 = arith.addf %158, %159 : vector<1x256xf32>
    %cst_45 = arith.constant 0.000000e+00 : f32
    %161 = vector.broadcast %cst_45 : f32 to vector<1x256xf32>
    %162 = arith.maximumf %160, %161 : vector<1x256xf32>
    %163 = math.absf %160 : vector<1x256xf32>
    %cst_46 = arith.constant 0.000000e+00 : f32
    %164 = vector.broadcast %cst_46 : f32 to vector<1x256xf32>
    %165 = arith.subf %164, %163 : vector<1x256xf32>
    %166 = math.exp %165 : vector<1x256xf32>
    %167 = math.log1p %166 : vector<1x256xf32>
    %168 = arith.addf %162, %167 : vector<1x256xf32>
    %169 = arith.maximumf %134, %168 : vector<1x256xf32>
    %170 = arith.subf %134, %169 : vector<1x256xf32>
    %171 = math.exp %170 : vector<1x256xf32>
    %172 = arith.subf %168, %169 : vector<1x256xf32>
    %173 = math.exp %172 : vector<1x256xf32>
    %174 = arith.mulf %171, %140 : vector<1x256xf32>
    %175 = arith.addf %174, %173 : vector<1x256xf32>
    %176 = arith.mulf %171, %144 : vector<1x256xf32>
    %cst_47 = arith.constant 2.000000e+00 : f32
    %177 = vector.broadcast %cst_47 : f32 to vector<1x256xf32>
    %178 = arith.mulf %177, %173 : vector<1x256xf32>
    %179 = arith.addf %176, %178 : vector<1x256xf32>
    %cst_48 = arith.constant 2.500000e+00 : f32
    %180 = vector.broadcast %cst_48 : f32 to vector<32x256xf32>
    %181 = arith.mulf %180, %46 : vector<32x256xf32>
    %182 = arith.addf %40, %181 : vector<32x256xf32>
    %cst_49 = arith.constant 0.000000e+00 : f32
    %183 = vector.broadcast %cst_49 : f32 to vector<32x256xf32>
    %184 = arith.maximumf %182, %183 : vector<32x256xf32>
    %cst_50 = arith.constant dense<0.000000e+00> : vector<32x256xf32>
    %185 = tpu.matmul %4, %184, %cst_50 {dimension_numbers = #tpu.dot_dimension_numbers<[1], [0], [0], [1], [0, 0, 1, 1], [], []>} : vector<32x32xf32>, vector<32x256xf32>, vector<32x256xf32> -> vector<32x256xf32>
    %186 = vector.broadcast %5 : vector<32x1xf32> to vector<32x256xf32>
    %187 = arith.addf %185, %186 : vector<32x256xf32>
    %cst_51 = arith.constant 0.000000e+00 : f32
    %188 = vector.broadcast %cst_51 : f32 to vector<32x256xf32>
    %189 = arith.maximumf %187, %188 : vector<32x256xf32>
    %190 = vector.broadcast %6 : vector<32x1xf32> to vector<32x256xf32>
    %191 = arith.mulf %190, %189 : vector<32x256xf32>
    %cst_52 = arith.constant dense<0.000000e+00> : vector<256xf32>
    %192 = vector.multi_reduction <add>, %191, %cst_52 [0] : vector<32x256xf32> to vector<256xf32>
    %193 = vector.shape_cast %192 : vector<256xf32> to vector<1x256xf32>
    %194 = vector.broadcast %7 : f32 to vector<1x256xf32>
    %195 = arith.addf %193, %194 : vector<1x256xf32>
    %cst_53 = arith.constant 0.000000e+00 : f32
    %196 = vector.broadcast %cst_53 : f32 to vector<1x256xf32>
    %197 = arith.maximumf %195, %196 : vector<1x256xf32>
    %198 = math.absf %195 : vector<1x256xf32>
    %cst_54 = arith.constant 0.000000e+00 : f32
    %199 = vector.broadcast %cst_54 : f32 to vector<1x256xf32>
    %200 = arith.subf %199, %198 : vector<1x256xf32>
    %201 = math.exp %200 : vector<1x256xf32>
    %202 = math.log1p %201 : vector<1x256xf32>
    %203 = arith.addf %197, %202 : vector<1x256xf32>
    %204 = arith.maximumf %169, %203 : vector<1x256xf32>
    %205 = arith.subf %169, %204 : vector<1x256xf32>
    %206 = math.exp %205 : vector<1x256xf32>
    %207 = arith.subf %203, %204 : vector<1x256xf32>
    %208 = math.exp %207 : vector<1x256xf32>
    %209 = arith.mulf %206, %175 : vector<1x256xf32>
    %210 = arith.addf %209, %208 : vector<1x256xf32>
    %211 = arith.mulf %206, %179 : vector<1x256xf32>
    %cst_55 = arith.constant 2.500000e+00 : f32
    %212 = vector.broadcast %cst_55 : f32 to vector<1x256xf32>
    %213 = arith.mulf %212, %208 : vector<1x256xf32>
    %214 = arith.addf %211, %213 : vector<1x256xf32>
    %cst_56 = arith.constant 3.000000e+00 : f32
    %215 = vector.broadcast %cst_56 : f32 to vector<32x256xf32>
    %216 = arith.mulf %215, %46 : vector<32x256xf32>
    %217 = arith.addf %40, %216 : vector<32x256xf32>
    %cst_57 = arith.constant 0.000000e+00 : f32
    %218 = vector.broadcast %cst_57 : f32 to vector<32x256xf32>
    %219 = arith.maximumf %217, %218 : vector<32x256xf32>
    %cst_58 = arith.constant dense<0.000000e+00> : vector<32x256xf32>
    %220 = tpu.matmul %4, %219, %cst_58 {dimension_numbers = #tpu.dot_dimension_numbers<[1], [0], [0], [1], [0, 0, 1, 1], [], []>} : vector<32x32xf32>, vector<32x256xf32>, vector<32x256xf32> -> vector<32x256xf32>
    %221 = vector.broadcast %5 : vector<32x1xf32> to vector<32x256xf32>
    %222 = arith.addf %220, %221 : vector<32x256xf32>
    %cst_59 = arith.constant 0.000000e+00 : f32
    %223 = vector.broadcast %cst_59 : f32 to vector<32x256xf32>
    %224 = arith.maximumf %222, %223 : vector<32x256xf32>
    %225 = vector.broadcast %6 : vector<32x1xf32> to vector<32x256xf32>
    %226 = arith.mulf %225, %224 : vector<32x256xf32>
    %cst_60 = arith.constant dense<0.000000e+00> : vector<256xf32>
    %227 = vector.multi_reduction <add>, %226, %cst_60 [0] : vector<32x256xf32> to vector<256xf32>
    %228 = vector.shape_cast %227 : vector<256xf32> to vector<1x256xf32>
    %229 = vector.broadcast %7 : f32 to vector<1x256xf32>
    %230 = arith.addf %228, %229 : vector<1x256xf32>
    %cst_61 = arith.constant 0.000000e+00 : f32
    %231 = vector.broadcast %cst_61 : f32 to vector<1x256xf32>
    %232 = arith.maximumf %230, %231 : vector<1x256xf32>
    %233 = math.absf %230 : vector<1x256xf32>
    %cst_62 = arith.constant 0.000000e+00 : f32
    %234 = vector.broadcast %cst_62 : f32 to vector<1x256xf32>
    %235 = arith.subf %234, %233 : vector<1x256xf32>
    %236 = math.exp %235 : vector<1x256xf32>
    %237 = math.log1p %236 : vector<1x256xf32>
    %238 = arith.addf %232, %237 : vector<1x256xf32>
    %239 = arith.maximumf %204, %238 : vector<1x256xf32>
    %240 = arith.subf %204, %239 : vector<1x256xf32>
    %241 = math.exp %240 : vector<1x256xf32>
    %242 = arith.subf %238, %239 : vector<1x256xf32>
    %243 = math.exp %242 : vector<1x256xf32>
    %244 = arith.mulf %241, %210 : vector<1x256xf32>
    %245 = arith.addf %244, %243 : vector<1x256xf32>
    %246 = arith.mulf %241, %214 : vector<1x256xf32>
    %cst_63 = arith.constant 3.000000e+00 : f32
    %247 = vector.broadcast %cst_63 : f32 to vector<1x256xf32>
    %248 = arith.mulf %247, %243 : vector<1x256xf32>
    %249 = arith.addf %246, %248 : vector<1x256xf32>
    %cst_64 = arith.constant 3.500000e+00 : f32
    %250 = vector.broadcast %cst_64 : f32 to vector<32x256xf32>
    %251 = arith.mulf %250, %46 : vector<32x256xf32>
    %252 = arith.addf %40, %251 : vector<32x256xf32>
    %cst_65 = arith.constant 0.000000e+00 : f32
    %253 = vector.broadcast %cst_65 : f32 to vector<32x256xf32>
    %254 = arith.maximumf %252, %253 : vector<32x256xf32>
    %cst_66 = arith.constant dense<0.000000e+00> : vector<32x256xf32>
    %255 = tpu.matmul %4, %254, %cst_66 {dimension_numbers = #tpu.dot_dimension_numbers<[1], [0], [0], [1], [0, 0, 1, 1], [], []>} : vector<32x32xf32>, vector<32x256xf32>, vector<32x256xf32> -> vector<32x256xf32>
    %256 = vector.broadcast %5 : vector<32x1xf32> to vector<32x256xf32>
    %257 = arith.addf %255, %256 : vector<32x256xf32>
    %cst_67 = arith.constant 0.000000e+00 : f32
    %258 = vector.broadcast %cst_67 : f32 to vector<32x256xf32>
    %259 = arith.maximumf %257, %258 : vector<32x256xf32>
    %260 = vector.broadcast %6 : vector<32x1xf32> to vector<32x256xf32>
    %261 = arith.mulf %260, %259 : vector<32x256xf32>
    %cst_68 = arith.constant dense<0.000000e+00> : vector<256xf32>
    %262 = vector.multi_reduction <add>, %261, %cst_68 [0] : vector<32x256xf32> to vector<256xf32>
    %263 = vector.shape_cast %262 : vector<256xf32> to vector<1x256xf32>
    %264 = vector.broadcast %7 : f32 to vector<1x256xf32>
    %265 = arith.addf %263, %264 : vector<1x256xf32>
    %cst_69 = arith.constant 0.000000e+00 : f32
    %266 = vector.broadcast %cst_69 : f32 to vector<1x256xf32>
    %267 = arith.maximumf %265, %266 : vector<1x256xf32>
    %268 = math.absf %265 : vector<1x256xf32>
    %cst_70 = arith.constant 0.000000e+00 : f32
    %269 = vector.broadcast %cst_70 : f32 to vector<1x256xf32>
    %270 = arith.subf %269, %268 : vector<1x256xf32>
    %271 = math.exp %270 : vector<1x256xf32>
    %272 = math.log1p %271 : vector<1x256xf32>
    %273 = arith.addf %267, %272 : vector<1x256xf32>
    %274 = arith.maximumf %239, %273 : vector<1x256xf32>
    %275 = arith.subf %239, %274 : vector<1x256xf32>
    %276 = math.exp %275 : vector<1x256xf32>
    %277 = arith.subf %273, %274 : vector<1x256xf32>
    %278 = math.exp %277 : vector<1x256xf32>
    %279 = arith.mulf %276, %245 : vector<1x256xf32>
    %280 = arith.addf %279, %278 : vector<1x256xf32>
    %281 = arith.mulf %276, %249 : vector<1x256xf32>
    %cst_71 = arith.constant 3.500000e+00 : f32
    %282 = vector.broadcast %cst_71 : f32 to vector<1x256xf32>
    %283 = arith.mulf %282, %278 : vector<1x256xf32>
    %284 = arith.addf %281, %283 : vector<1x256xf32>
    %cst_72 = arith.constant 4.000000e+00 : f32
    %285 = vector.broadcast %cst_72 : f32 to vector<32x256xf32>
    %286 = arith.mulf %285, %46 : vector<32x256xf32>
    %287 = arith.addf %40, %286 : vector<32x256xf32>
    %cst_73 = arith.constant 0.000000e+00 : f32
    %288 = vector.broadcast %cst_73 : f32 to vector<32x256xf32>
    %289 = arith.maximumf %287, %288 : vector<32x256xf32>
    %cst_74 = arith.constant dense<0.000000e+00> : vector<32x256xf32>
    %290 = tpu.matmul %4, %289, %cst_74 {dimension_numbers = #tpu.dot_dimension_numbers<[1], [0], [0], [1], [0, 0, 1, 1], [], []>} : vector<32x32xf32>, vector<32x256xf32>, vector<32x256xf32> -> vector<32x256xf32>
    %291 = vector.broadcast %5 : vector<32x1xf32> to vector<32x256xf32>
    %292 = arith.addf %290, %291 : vector<32x256xf32>
    %cst_75 = arith.constant 0.000000e+00 : f32
    %293 = vector.broadcast %cst_75 : f32 to vector<32x256xf32>
    %294 = arith.maximumf %292, %293 : vector<32x256xf32>
    %295 = vector.broadcast %6 : vector<32x1xf32> to vector<32x256xf32>
    %296 = arith.mulf %295, %294 : vector<32x256xf32>
    %cst_76 = arith.constant dense<0.000000e+00> : vector<256xf32>
    %297 = vector.multi_reduction <add>, %296, %cst_76 [0] : vector<32x256xf32> to vector<256xf32>
    %298 = vector.shape_cast %297 : vector<256xf32> to vector<1x256xf32>
    %299 = vector.broadcast %7 : f32 to vector<1x256xf32>
    %300 = arith.addf %298, %299 : vector<1x256xf32>
    %cst_77 = arith.constant 0.000000e+00 : f32
    %301 = vector.broadcast %cst_77 : f32 to vector<1x256xf32>
    %302 = arith.maximumf %300, %301 : vector<1x256xf32>
    %303 = math.absf %300 : vector<1x256xf32>
    %cst_78 = arith.constant 0.000000e+00 : f32
    %304 = vector.broadcast %cst_78 : f32 to vector<1x256xf32>
    %305 = arith.subf %304, %303 : vector<1x256xf32>
    %306 = math.exp %305 : vector<1x256xf32>
    %307 = math.log1p %306 : vector<1x256xf32>
    %308 = arith.addf %302, %307 : vector<1x256xf32>
    %309 = arith.maximumf %274, %308 : vector<1x256xf32>
    %310 = arith.subf %274, %309 : vector<1x256xf32>
    %311 = math.exp %310 : vector<1x256xf32>
    %312 = arith.subf %308, %309 : vector<1x256xf32>
    %313 = math.exp %312 : vector<1x256xf32>
    %314 = arith.mulf %311, %280 : vector<1x256xf32>
    %315 = arith.addf %314, %313 : vector<1x256xf32>
    %316 = arith.mulf %311, %284 : vector<1x256xf32>
    %cst_79 = arith.constant 4.000000e+00 : f32
    %317 = vector.broadcast %cst_79 : f32 to vector<1x256xf32>
    %318 = arith.mulf %317, %313 : vector<1x256xf32>
    %319 = arith.addf %316, %318 : vector<1x256xf32>
    %320 = tpu.reciprocal %319 : vector<1x256xf32> -> vector<1x256xf32>
    %321 = arith.mulf %315, %320 : vector<1x256xf32>
    %c0_80 = arith.constant 0 : index
    %c0_81 = arith.constant 0 : index
    %322 = vector.load %arg9[%c0_80, %c0_81] : memref<1x256xf32, #tpu.memory_space<vmem>>, vector<1x256xf32>
    tpu.vector_store %arg9[%c0_80, %c0_81], %321 {strides = array<i32>} : memref<1x256xf32, #tpu.memory_space<vmem>>, vector<1x256xf32>,
    return
  }
  func.func @transform_0(%arg0: i32) -> (i32, i32) {
    %c0_i32 = arith.constant 0 : i32
    %c0_i32_0 = arith.constant 0 : i32
    return %c0_i32, %arg0 : i32, i32
  }
  func.func @transform_1(%arg0: i32) -> (i32, i32) {
    %c0_i32 = arith.constant 0 : i32
    %c0_i32_0 = arith.constant 0 : i32
    return %c0_i32, %arg0 : i32, i32
  }
  func.func @transform_2(%arg0: i32) -> (i32, i32) {
    %c0_i32 = arith.constant 0 : i32
    %c0_i32_0 = arith.constant 0 : i32
    %c0_i32_1 = arith.constant 0 : i32
    return %c0_i32, %c0_i32_0 : i32, i32
  }
  func.func @transform_3(%arg0: i32) -> (i32, i32) {
    %c0_i32 = arith.constant 0 : i32
    %c0_i32_0 = arith.constant 0 : i32
    %c0_i32_1 = arith.constant 0 : i32
    return %c0_i32, %c0_i32_0 : i32, i32
  }
  func.func @transform_4(%arg0: i32) -> (i32, i32) {
    %c0_i32 = arith.constant 0 : i32
    %c0_i32_0 = arith.constant 0 : i32
    %c0_i32_1 = arith.constant 0 : i32
    return %c0_i32, %c0_i32_0 : i32, i32
  }
  func.func @transform_5(%arg0: i32) -> (i32, i32) {
    %c0_i32 = arith.constant 0 : i32
    %c0_i32_0 = arith.constant 0 : i32
    %c0_i32_1 = arith.constant 0 : i32
    return %c0_i32, %c0_i32_0 : i32, i32
  }
  func.func @transform_6(%arg0: i32) -> (i32, i32) {
    %c0_i32 = arith.constant 0 : i32
    %c0_i32_0 = arith.constant 0 : i32
    %c0_i32_1 = arith.constant 0 : i32
    return %c0_i32, %c0_i32_0 : i32, i32
  }
  func.func @transform_7(%arg0: i32) -> i32 {
    %c0_i32 = arith.constant 0 : i32
    %c0_i32_0 = arith.constant 0 : i32
    return %c0_i32 : i32
  }
  func.func @transform_8(%arg0: i32) -> (i32, i32) {
    %c0_i32 = arith.constant 0 : i32
    %c0_i32_0 = arith.constant 0 : i32
    return %c0_i32, %arg0 : i32, i32
  }
}

</mosaic_0001>

<bundles_post_ra>
// kernel: tpu_custom_call.1
= control target key start
LH: loop header
LB: loop body
LE: loop exit
PB: predicated region body
PF: predicated region fallthrough
CT: control target
= control target key end

     0   :  { %s3898_s0 = inlined_call_operand.vmem [shape: f32[3,512], index: 0, kind: input, shape index: {}]   ;;  %s3899_s1 = inlined_call_operand.vmem [shape: f32[3,512], index: 1, kind: input, shape index: {}]   ;;  %s3900_s2 = inlined_call_operand.vmem [shape: f32[32,3], index: 2, kind: input, shape index: {}]   ;;  %s3901_s3 = inlined_call_operand.vmem [shape: f32[32,1], index: 3, kind: input, shape index: {}]   ;;  %s3902_s4 = inlined_call_operand.vmem [shape: f32[32,32], index: 4, kind: input, shape index: {}]   ;;  %s3903_s5 = inlined_call_operand.vmem [shape: f32[32,1], index: 5, kind: input, shape index: {}]   ;;  %s3904_s6 = inlined_call_operand.vmem [shape: f32[32,1], index: 6, kind: input, shape index: {}]   ;;  %s3905_s7 = inlined_call_operand.<no memory space> [shape: f32[1], index: 7, kind: input, shape index: {}]   ;;  %s3906_s8 = inlined_call_operand.hbm [shape: f32[1,512], index: 8, kind: output, shape index: {}]  }
   0x1   :  { %13 = sst [smem:[#allocation2]] %s3905_s7 }
   0x2   :  { %14 = vsyncpa [#allocation4], 0 }
   0x3   :  { %16 = vsyncpa [#allocation4 + $0x1], 0  ;;  %s2728_s29 = smov 0   ;;  %s2730_s30 = smov 0  }
   0x4   :  { %s2732_s9 = smov 0   ;;  %s2734_s10 = smov 0  }
   0x5 LB: > { %s2749_s7 = sadd.s32 4294967295, %s2672_s10   ;;  %s2386_s11 = sadd.s32 4294967294, %s2672_s10   ;;  %s2672_s10 = sphi %s2734_s10, %s3948_s10   ;;  %s2668_s9 = sphi %s2732_s9, %s3947_s9   ;;  %s2664_s30 = sphi %s2730_s30, %s3946_s30   ;;  %s2660_s29 = sphi %s2728_s29, %s3945_s29  }
   0x6   : > { %s2753_s12 = sadd.s32 1, %s2672_s10   ;;  %s207_s13 = sadd.s32 1, %s2668_s9 }
   0x7   : > { %s204_s14 = ssub.s32 %s2672_s10, %s2753_s12  ;;  %p217_p0 = scmp.ne.s32.totalorder %s2668_s9, %s2664_s30 }
   0x8   : > { %p205_p1 = scmp.eq.s32.totalorder %s204_s14, 0  ;;  %p218_p2 = scmp.eq.s32.totalorder %s2749_s7, 1 }
   0x9   : > { %p223_p3 = scmp.ne.s32.totalorder %s2664_s30, %s2660_s29  ;;  %p224_p4 = scmp.eq.s32.totalorder %s2386_s11, 1 }
   0xa   : > { %s2764_s15 = scalar_select %p205_p1, %s2668_s9, %s207_s13  }
   0xb   : > { %p2766_p5 = por %p218_p2, %p217_p0  ;;  %p2770_p6 = por %p224_p4, %p223_p3 }
   0xc   : > { %p2389_p7 = scmp.ge.s32.totalorder %s2672_s10, 1  ;;  %p278_p8 = scmp.lt.s32.totalorder %s2672_s10, 3 }
   0xe   : > { %p279_p9 = pnand %p2389_p7, %p278_p8 }
   0xf   : > { %s2391_s28 = sshll.u32 (!%p279_p9), %s2749_s7, 1  ;;  %s352_s24 = sld [smem:[#allocation2]] (!%p279_p9) }
  0x10   : > { %282 = sbr.rel (%p279_p9) target bundleno = 641 (0x281), region = 52  ;;  %p318_p10 = scmp.lt.s32.totalorder (!%p279_p9), %s2391_s28, 3 }
  0x11   : > { %s314_s25 = sand.u32 (!%p279_p9), 1, %s2664_s30   ;;  %s2679_s21 = smov (!%p279_p9), [#allocation3]  }
  0x12   : > { %s2390_s26 = sshll.u32 (!%p279_p9), %s314_s25, 1  ;;  %s2301_s19 = scalar_lea.sflag (!%p279_p9), [#allocation4], %s314_s25 }
  0x15   : > { %v335_v0 = vld [vmem:[%s3900_s2 + $0x18] sm:$0xff]  ;;  %v334_v1 = vld [vmem:[%s3900_s2 + $0x10] sm:$0xff]  ;;  %v2674_v2 = vmov 2   ;;  %v2675_v3 = vmov 0   ;;  %v2676_v5 = vmov 1   ;;  %v333_v6 = vld [vmem:[%s3900_s2 + $0x8] sm:$0xff]  ;;  %v3907_v16 = vlaneseq }
  0x16   : > { %2479 = vset.pattern.permute.xlu0 %v2674_v2  ;;  %2477 = vset.pattern.permute.xlu1 %v2675_v3  ;;  %v339_v4 = vld [vmem:[%s3901_s3 + $0x18] sm:$0xff]  ;;  %v337_v7 = vld [vmem:[%s3901_s3 + $0x8] sm:$0xff]  ;;  %v338_v8 = vld [vmem:[%s3901_s3 + $0x10] sm:$0xff]  ;;  %v2677_v15 = vmov 0.0   ;;  %s3950_s28 = smov (!%p318_p10, %s2391_s28), 3  ;;  %vm675_vm0 = vcmask 261120  }
  0x17   : > { %560 = vperm.xlu0 %2479, %v335_v0   ;;  %365 = vperm.xlu1 %2477, %v334_v1   ;;  %v336_v9 = vld [vmem:[%s3901_s3] sm:$0xff]  ;;  %v346_v12 = vld [vmem:[%s3903_s5 + $0x10] sm:$0xff]  ;;  %v345_v17 = vld [vmem:[%s3903_s5 + $0x8] sm:$0xff]  ;;  %s2392_s14 = sshll.u32 %s3950_s28, 2  ;;  %v2822_v19 = vshrl.u32 %v3907_v16, 7  ;;  %s316_s28 = scalar_lea.vmem [#allocation3], %s2390_s26 }
  0x18   : > { %v344_v10 = vld [vmem:[%s3903_s5] sm:$0xff]  ;;  %v350_v14 = vld [vmem:[%s3904_s6 + $0x10] sm:$0xff]  ;;  %944 = vmatprep.mubr.f32.mxu1 %v2677_v15  ;;  %752 = vmatprep.mubr.f32.mxu0 %v2677_v15  ;;  %v347_v18 = vld [vmem:[%s3903_s5 + $0x18] sm:$0xff]  ;;  %s327_s22 = scalar_lea.vmem %s3899_s1, %s2392_s14  ;;  %s321_s27 = scalar_lea.vmem %s3898_s0, %s2392_s14 }
  0x19   : > { %v332_v11 = vld [vmem:[%s3900_s2] sm:$0xff]  ;;  %v565_v22 = vsub.s32 2, %v2822_v19  ;;  %v569_v23 = vsub.s32 6, %v2822_v19  ;;  %v349_v24 = vld [vmem:[%s3904_s6 + $0x8] sm:$0xff]  ;;  %v376_v25 = vsub.s32 0, %v2822_v19  ;;  %v380_v26 = vsub.s32 4, %v2822_v19 }
  0x1a   : > { %v348_v13 = vld [vmem:[%s3904_s6] sm:$0xff]  ;;  %v481_v27 = vsub.s32 1, %v2822_v19  ;;  %v485_v28 = vsub.s32 5, %v2822_v19  ;;  %v351_v35 = vld [vmem:[%s3904_s6 + $0x18] sm:$0xff]  ;;  %s2315_s11 = sshll.u32 %s316_s28, 4  ;;  %s2316_s11 = int_to_ptr.vmem [resolvable:$true] %s2315_s11 }
  0x1b   : > { %2480 = vset.pattern.permute.xlu0 %v2676_v5  ;;  %417 = vperm.xlu1 %2477, %v339_v4   ;;  %v331_v29 = vld [vmem:[%s327_s22] sm:$0x77]  ;;  %s2612_s20 = scalar_lea.vmem %s2316_s11, 32 }
  0x1c   : > { %476 = vperm.xlu0 %2480, %v335_v0   ;;  %v330_v32 = vld [vmem:[%s321_s27] sm:$0x77]  ;;  %v600_v33 = vrot.slane %v331_v29, %v565_v22  ;;  %v604_v34 = vrot.slane %v331_v29, %v569_v23  ;;  %v432_v36 = vrot.slane %v331_v29, %v376_v25  ;;  %v436_v37 = vrot.slane %v331_v29, %v380_v26  ;;  %s2432_s27 = sshll.u32 %s2749_s7, 5  ;;  %p2613_p11 = scmp.ne.s32.totalorder %s2316_s11, %s2612_s20 }
  0x1d   : > { %v516_v38 = vrot.slane %v331_v29, %v481_v27  ;;  %v520_v39 = vrot.slane %v331_v29, %v485_v28  ;;  %v566_v40 = vrot.slane %v330_v32, %v565_v22  ;;  %v570_v41 = vrot.slane %v330_v32, %v569_v23  ;;  %s2313_s18 = scalar_lea.hbm %s3906_s8, %s2432_s27  ;;  %s2616_s7 = sshll.u32 %s2679_s21, 4  ;;  %s2617_s7 = int_to_ptr.vmem [resolvable:$false] %s2616_s7 }
  0x1e   : > { %v482_v42 = vrot.slane %v330_v32, %v481_v27  ;;  %v486_v43 = vrot.slane %v330_v32, %v485_v28  ;;  %v377_v46 = vrot.slane %v330_v32, %v376_v25  ;;  %v381_v47 = vrot.slane %v330_v32, %v380_v26  ;;  %p2614_p12 = pnand %p2613_p11, %p2766_p5  ;;  %s2618_s22 = scalar_lea.vmem %s2617_s7, 64 }
  0x1f   : > { %2478 = vset.pattern.permute.xlu1 %v2676_v5  ;;  %v2846_v48 = vrot.slane %v600_v33, %v565_v22  ;;  %v2848_v49 = vrot.slane %v604_v34, %v565_v22  ;;  %v2850_v50 = vrot.slane %v432_v36, %v376_v25  ;;  %v2852_v51 = vrot.slane %v436_v37, %v376_v25  ;;  %p2619_p0 = scmp.lt.s32.totalorder %s2316_s11, %s2617_s7  ;;  %p2620_p1 = scmp.lt.s32.totalorder %s2618_s22, %s2612_s20 }
  0x20   : > { %472 = vperm.xlu1 %2478, %v334_v1   ;;  %468 = vperm.xlu0 %2480, %v333_v6   ;;  %v2854_v52 = vrot.slane %v516_v38, %v481_v27  ;;  %v2856_v53 = vrot.slane %v520_v39, %v481_v27  ;;  %v2858_v54 = vrot.slane %v566_v40, %v565_v22  ;;  %p2615_p13 = pneg %p2614_p12 }
  0x21   : > { %v2860_v55 = vrot.slane %v570_v41, %v565_v22  ;;  %v2862_v56 = vrot.slane %v482_v42, %v481_v27  ;;  %v2864_v57 = vrot.slane %v486_v43, %v481_v27  ;;  %v2868_v60 = vrot.slane %v377_v46, %v376_v25  ;;  %p2621_p2 = por %p2620_p1, %p2619_p0 }
  0x22   : > { %v2870_v61 = vrot.slane %v381_v47, %v376_v25 }
  0x23   : > { %p2622_p3 = pnand %p2621_p2, %p2615_p13 }
  0x24   : > { %2481 = vset.pattern.permute.xlu1 %v2675_v3  ;;  %2482 = vset.pattern.permute.xlu0 %v2675_v3 }
  0x25   : > { %370 = vperm.xlu0 %2482, %v335_v0   ;;  %360 = vperm.xlu1 %2481, %v333_v6  }
  0x29   : > { %407 = vperm.xlu0 %2482, %v337_v7   ;;  %412 = vperm.xlu1 %2481, %v338_v8  }
  0x2d   : > { %402 = vperm.xlu0 %2482, %v336_v9   ;;  %2483 = vset.pattern.permute.xlu1 %v2674_v2 }
  0x2e   : > { %556 = vperm.xlu1 %2483, %v334_v1  }
  0x31   : > { %657 = vperm.xlu0 %2482, %v344_v10  }
  0x32   : > { %2484 = vset.pattern.permute.xlu1 %v2675_v3 }
  0x33   : > { %355 = vperm.xlu1 %2484, %v332_v11  }
  0x35   : > { %667 = vperm.xlu0 %2482, %v346_v12  }
  0x37   : > { %2485 = vset.pattern.permute.xlu1 %v2676_v5 }
  0x38   : > { %464 = vperm.xlu1 %2485, %v332_v11  }
  0x39   : > { %787 = vperm.xlu0 %2482, %v348_v13  }
  0x3c   : > { %2486 = vset.pattern.permute.xlu1 %v2674_v2 }
  0x3d   : > { %797 = vperm.xlu0 %2482, %v350_v14   ;;  %552 = vperm.xlu1 %2486, %v333_v6  }
  0x41   : > { %548 = vperm.xlu1 %2486, %v332_v11  }
  0x45   : > { %2487 = vset.pattern.permute.xlu1 %v2675_v3 }
  0x46   : > { %662 = vperm.xlu1 %2487, %v345_v17  }
  0x4a   : > { %672 = vperm.xlu1 %2487, %v347_v18  }
  0x4e   : > { %792 = vperm.xlu1 %2487, %v349_v24  }
  0x52   : > { %802 = vperm.xlu1 %2487, %v351_v35  }
  0x92   : > { %v2824_v20 = vpop.permute.xlu1 %365  ;;  %v561_v21 = vpop.permute.xlu0 %560 }
  0x93   : > { %v621_v62 = vmul.f32 %v2846_v48, %v561_v21  ;;  %v622_v63 = vmul.f32 %v2848_v49, %v561_v21  ;;  %v451_v8 = vmul.f32 %v2850_v50, %v2824_v20  ;;  %v452_v9 = vmul.f32 %v2852_v51, %v2824_v20 }
  0x94   : > { %v587_v10 = vmul.f32 %v2858_v54, %v561_v21  ;;  %v588_v11 = vmul.f32 %v2860_v55, %v561_v21  ;;  %v396_v24 = vmul.f32 %v2868_v60, %v2824_v20  ;;  %v397_v25 = vmul.f32 %v2870_v61, %v2824_v20 }
  0x96   : > { %v418_v30 = vpop.permute.xlu1 %417 }
  0x97   : > { %v477_v31 = vpop.permute.xlu0 %476 }
  0x98   : > { %v537_v58 = vmul.f32 %v2854_v52, %v477_v31  ;;  %v538_v59 = vmul.f32 %v2856_v53, %v477_v31  ;;  %v503_v0 = vmul.f32 %v2862_v56, %v477_v31  ;;  %v504_v1 = vmul.f32 %v2864_v57, %v477_v31 }
  0x9b   : > { %v473_v44 = vpop.permute.xlu1 %472  ;;  %v2844_v45 = vpop.permute.xlu0 %468 }
  0x9c   : > { %v535_v18 = vmul.f32 %v2854_v52, %v473_v44  ;;  %v536_v22 = vmul.f32 %v2856_v53, %v473_v44  ;;  %v501_v31 = vmul.f32 %v2862_v56, %v473_v44  ;;  %v502_v32 = vmul.f32 %v2864_v57, %v473_v44 }
  0x9e   : > { %v543_v36 = vadd.f32 %v535_v18, %v451_v8  ;;  %v544_v37 = vadd.f32 %v536_v22, %v452_v9  ;;  %v534_v8 = vmul.f32 %v2856_v53, %v2844_v45  ;;  %v499_v22 = vmul.f32 %v2862_v56, %v2844_v45 }
  0xa0   : > { %v371_v2 = vpop.permute.xlu0 %370  ;;  %v2876_v3 = vpop.permute.xlu1 %360 }
  0xa1   : > { %v398_v4 = vmul.f32 %v2868_v60, %v371_v2  ;;  %v399_v5 = vmul.f32 %v2870_v61, %v371_v2  ;;  %v453_v6 = vmul.f32 %v2850_v50, %v371_v2  ;;  %v454_v7 = vmul.f32 %v2852_v51, %v371_v2 }
  0xa2   : > { %v395_v18 = vmul.f32 %v2870_v61, %v2876_v3 }
  0xa3   : > { %v426_v12 = vadd.f32 %v418_v30, %v398_v4  ;;  %v427_v13 = vadd.f32 %v418_v30, %v399_v5  ;;  %v545_v14 = vadd.f32 %v537_v58, %v453_v6  ;;  %v546_v17 = vadd.f32 %v538_v59, %v454_v7 }
  0xa4   : > { %v413_v23 = vpop.permute.xlu1 %412  ;;  %v533_v7 = vmul.f32 %v2854_v52, %v2844_v45  ;;  %v408_v9 = vpop.permute.xlu0 %407 }
  0xa5   : > { %v511_v26 = vadd.f32 %v503_v0, %v426_v12  ;;  %v512_v27 = vadd.f32 %v504_v1, %v427_v13  ;;  %v2894_v28 = vadd.f32 %v621_v62, %v545_v14  ;;  %v2896_v21 = vadd.f32 %v622_v63, %v546_v17 }
  0xa6   : > { %v424_v29 = vadd.f32 %v413_v23, %v396_v24  ;;  %v425_v30 = vadd.f32 %v413_v23, %v397_v25  ;;  %v394_v17 = vmul.f32 %v2868_v60, %v2876_v3  ;;  %v500_v23 = vmul.f32 %v2864_v57, %v2844_v45 }
  0xa7   : > { %v2900_v33 = vadd.f32 %v587_v10, %v511_v26  ;;  %v2902_v34 = vadd.f32 %v588_v11, %v512_v27  ;;  %v638_v35 = vmul.f32 0.5, %v2896_v21  ;;  %v637_v20 = vmul.f32 0.5, %v2894_v28 }
  0xa8   : > { %v509_v38 = vadd.f32 %v501_v31, %v424_v29  ;;  %v510_v39 = vadd.f32 %v502_v32, %v425_v30  ;;  %v449_v29 = vmul.f32 %v2850_v50, %v2876_v3  ;;  %v450_v30 = vmul.f32 %v2852_v51, %v2876_v3  ;;  %v403_v3 = vpop.permute.xlu0 %402 }
  0xa9   : > { %v557_v40 = vpop.permute.xlu1 %556  ;;  %v646_v41 = vadd.f32 %v638_v35, %v2902_v34  ;;  %v871_v42 = vadd.f32 %v2896_v21, %v2902_v34  ;;  %v645_v43 = vadd.f32 %v637_v20, %v2900_v33  ;;  %v870_v44 = vadd.f32 %v2894_v28, %v2900_v33 }
  0xaa   : > { %v585_v46 = vmul.f32 %v2858_v54, %v557_v40  ;;  %v586_v47 = vmul.f32 %v2860_v55, %v557_v40  ;;  %v619_v58 = vmul.f32 %v2846_v48, %v557_v40  ;;  %v620_v59 = vmul.f32 %v2848_v49, %v557_v40 }
  0xab   : > { %v654_v62 = vmax.f32 %v646_v41, 0.0  ;;  %v879_v63 = vmax.f32 %v871_v42, 0.0  ;;  %v653_v0 = vmax.f32 %v645_v43, 0.0  ;;  %v878_v1 = vmax.f32 %v870_v44, 0.0 }
  0xac   : > { %v2916_v2 = vadd.f32 %v585_v46, %v509_v38  ;;  %v2918_v4 = vadd.f32 %v586_v47, %v510_v39  ;;  %v2920_v5 = vadd.f32 %v619_v58, %v543_v36  ;;  %v2922_v6 = vadd.f32 %v620_v59, %v544_v37 }
  0xad   : > { %712 = vmatprep.subr.mxu0 %v654_v62  ;;  %904 = vmatprep.subr.mxu1 %v879_v63  ;;  %v422_v31 = vadd.f32 %v408_v9, %v394_v17  ;;  %v423_v32 = vadd.f32 %v408_v9, %v395_v18  ;;  %v1265_v38 = vmul.f32 2.0, %v2896_v21  ;;  %v541_v39 = vadd.f32 %v533_v7, %v449_v29 }
  0xae   : > { %v356_v10 = vpop.permute.xlu1 %355  ;;  %713 = vmatpush1.msra.mxu0 %v653_v0  ;;  %905 = vmatpush1.msra.mxu1 %v878_v1  ;;  %v869_v11 = vadd.f32 %v2922_v6, %v2918_v4  ;;  %v868_v12 = vadd.f32 %v2920_v5, %v2916_v2  ;;  %v636_v13 = vmul.f32 0.5, %v2922_v6  ;;  %v635_v14 = vmul.f32 0.5, %v2920_v5 }
  0xaf   : > { %v392_v36 = vmul.f32 %v2868_v60, %v356_v10  ;;  %v393_v45 = vmul.f32 %v2870_v61, %v356_v10  ;;  %v542_v40 = vadd.f32 %v534_v8, %v450_v30  ;;  %v507_v41 = vadd.f32 %v499_v22, %v422_v31 }
  0xb0   : > { %v877_v24 = vmax.f32 %v869_v11, 0.0  ;;  %v876_v25 = vmax.f32 %v868_v12, 0.0  ;;  %v644_v26 = vadd.f32 %v636_v13, %v2918_v4  ;;  %v643_v27 = vadd.f32 %v635_v14, %v2916_v2 }
  0xb1   : > { %v508_v42 = vadd.f32 %v500_v23, %v423_v32  ;;  %v447_v43 = vmul.f32 %v2850_v50, %v356_v10  ;;  %v1264_v44 = vmul.f32 2.0, %v2894_v28  ;;  %v1062_v46 = vmul.f32 1.5, %v2896_v21 }
  0xb2   : > { %906 = vmatprep.subr.mxu1 %v877_v24  ;;  %v652_v35 = vmax.f32 %v644_v26, 0.0  ;;  %v651_v20 = vmax.f32 %v643_v27, 0.0  ;;  %v1061_v60 = vmul.f32 1.5, %v2894_v28  ;;  %v420_v61 = vadd.f32 %v403_v3, %v392_v36 }
  0xb3   : > { %v465_v37 = vpop.permute.xlu1 %464  ;;  %907 = vmatpush1.msra.mxu1 %v876_v25  ;;  %v421_v47 = vadd.f32 %v403_v3, %v393_v45  ;;  %v448_v58 = vmul.f32 %v2852_v51, %v356_v10  ;;  %v2957_v59 = vadd.f32 %v1265_v38, %v2902_v34  ;;  %v2968_v10 = vadd.f32 %v1264_v44, %v2900_v33 }
  0xb4   : > { %714 = vmatprep.subr.mxu0 %v652_v35  ;;  %v497_v62 = vmul.f32 %v2862_v56, %v465_v37  ;;  %v498_v63 = vmul.f32 %v2864_v57, %v465_v37  ;;  %v531_v0 = vmul.f32 %v2854_v52, %v465_v37  ;;  %v532_v50 = vmul.f32 %v2856_v53, %v465_v37 }
  0xb5   : > { %715 = vmatpush1.msra.mxu0 %v651_v20  ;;  %v2971_v56 = vadd.f32 %v1062_v46, %v2902_v34  ;;  %v1263_v57 = vmul.f32 2.0, %v2922_v6  ;;  %v1262_v52 = vmul.f32 2.0, %v2920_v5  ;;  %v1060_v3 = vmul.f32 1.5, %v2922_v6 }
  0xb6   : > { %v505_v14 = vadd.f32 %v497_v62, %v420_v61  ;;  %v506_v17 = vadd.f32 %v498_v63, %v421_v47  ;;  %v539_v18 = vadd.f32 %v531_v0, %v447_v43  ;;  %v540_v22 = vadd.f32 %v532_v50, %v448_v58  ;;  %v3016_v58 = vld [vmem:[%s3902_s4] sm:$0xff] }
  0xb7   : > { %v1271_v62 = vadd.f32 %v1263_v57, %v2918_v4  ;;  %v1069_v63 = vadd.f32 %v1061_v60, %v2900_v33  ;;  %v1059_v0 = vmul.f32 1.5, %v2920_v5  ;;  %v1280_v60 = vmax.f32 %v2968_v10, 0.0 }
  0xb8   : > { %v553_v1 = vpop.permute.xlu1 %552 }
  0xb9   : > { %v583_v7 = vmul.f32 %v2858_v54, %v553_v1  ;;  %v584_v8 = vmul.f32 %v2860_v55, %v553_v1  ;;  %v617_v9 = vmul.f32 %v2846_v48, %v553_v1  ;;  %v618_v51 = vmul.f32 %v2848_v49, %v553_v1 }
  0xba   : > { %v1077_v10 = vmax.f32 %v1069_v63, 0.0 }
  0xbb   : > { %v2975_v53 = vadd.f32 %v583_v7, %v507_v41  ;;  %v2977_v11 = vadd.f32 %v584_v8, %v508_v42  ;;  %v2979_v12 = vadd.f32 %v617_v9, %v541_v39  ;;  %v2981_v13 = vadd.f32 %v618_v51, %v542_v40 }
  0xbc   : > { %v549_v23 = vpop.permute.xlu1 %548  ;;  %v1270_v7 = vadd.f32 %v1262_v52, %v2916_v2  ;;  %v1281_v9 = vmax.f32 %v2957_v59, 0.0  ;;  %v1068_v51 = vadd.f32 %v1060_v3, %v2918_v4  ;;  %v1279_v59 = vmax.f32 %v1271_v62, 0.0 }
  0xbd   : > { %v581_v24 = vmul.f32 %v2858_v54, %v549_v23  ;;  %v582_v25 = vmul.f32 %v2860_v55, %v549_v23  ;;  %v615_v26 = vmul.f32 %v2846_v48, %v549_v23  ;;  %v616_v27 = vmul.f32 %v2848_v49, %v549_v23 }
  0xbe   : > { %v867_v29 = vadd.f32 %v2981_v13, %v2977_v11  ;;  %v866_v30 = vadd.f32 %v2979_v12, %v2975_v53  ;;  %v634_v31 = vmul.f32 0.5, %v2981_v13  ;;  %v633_v32 = vmul.f32 0.5, %v2979_v12 }
  0xbf   : > { %v2993_v35 = vadd.f32 %v581_v24, %v505_v14  ;;  %v2995_v20 = vadd.f32 %v582_v25, %v506_v17  ;;  %v2997_v54 = vadd.f32 %v615_v26, %v539_v18  ;;  %v2999_v55 = vadd.f32 %v616_v27, %v540_v22  ;;  %v3043_v27 = vld [vmem:[%s3902_s4 + $0x8] sm:$0xff] }
  0xc0   : > { %v875_v48 = vmax.f32 %v867_v29, 0.0  ;;  %v874_v49 = vmax.f32 %v866_v30, 0.0  ;;  %v642_v36 = vadd.f32 %v634_v31, %v2977_v11  ;;  %v641_v45 = vadd.f32 %v633_v32, %v2975_v53 }
  0xc1   : > { %v865_v37 = vadd.f32 %v2999_v55, %v2995_v20  ;;  %v864_v38 = vadd.f32 %v2997_v54, %v2993_v35  ;;  %v632_v39 = vmul.f32 0.5, %v2999_v55  ;;  %v631_v40 = vmul.f32 0.5, %v2997_v54 }
  0xc2   : > { %908 = vmatprep.subr.mxu1 %v875_v48  ;;  %v650_v41 = vmax.f32 %v642_v36, 0.0  ;;  %v649_v42 = vmax.f32 %v641_v45, 0.0  ;;  %v1261_v43 = vmul.f32 2.0, %v2981_v13  ;;  %v1260_v8 = vmul.f32 2.0, %v2979_v12 }
  0xc3   : > { %909 = vmatpush1.msra.mxu1 %v874_v49  ;;  %v873_v44 = vmax.f32 %v865_v37, 0.0  ;;  %v872_v46 = vmax.f32 %v864_v38, 0.0  ;;  %v640_v61 = vadd.f32 %v632_v39, %v2995_v20  ;;  %v639_v47 = vadd.f32 %v631_v40, %v2993_v35 }
  0xc4   : > { %716 = vmatprep.subr.mxu0 %v650_v41  ;;  %v1058_v14 = vmul.f32 1.5, %v2981_v13  ;;  %v1259_v57 = vmul.f32 2.0, %v2999_v55  ;;  %v1078_v17 = vmax.f32 %v2971_v56, 0.0  ;;  %v1269_v52 = vadd.f32 %v1261_v43, %v2977_v11 }
  0xc5   : > { %717 = vmatpush1.msra.mxu0 %v649_v42  ;;  %910 = vmatprep.subr.mxu1 %v873_v44  ;;  %v648_v50 = vmax.f32 %v640_v61, 0.0  ;;  %v647_v1 = vmax.f32 %v639_v47, 0.0  ;;  %v1057_v18 = vmul.f32 1.5, %v2979_v12  ;;  %v1067_v22 = vadd.f32 %v1059_v0, %v2916_v2  ;;  %v3064_v61 = vld [vmem:[%s3902_s4 + $0x10] sm:$0xff] }
  0xc6   : > { %911 = vmatpush1.msra.mxu1 %v872_v46  ;;  %v1258_v23 = vmul.f32 2.0, %v2997_v54  ;;  %v1056_v24 = vmul.f32 1.5, %v2999_v55  ;;  %v1278_v25 = vmax.f32 %v1270_v7, 0.0  ;;  %v1268_v56 = vadd.f32 %v1260_v8, %v2975_v53 }
  0xc7   : > { %718 = vmatprep.subr.mxu0 %v648_v50  ;;  %2399 = vmatmul.mubr.msk.f32.vlgmr.msra.gmra.mxu1 %vm675_vm0, %v3016_v58  ;;  %v1671_v26 = vmul.f32 3.0, %v2896_v21  ;;  %v1076_v29 = vmax.f32 %v1068_v51, 0.0  ;;  %v1066_v30 = vadd.f32 %v1058_v14, %v2977_v11  ;;  %v1267_v31 = vadd.f32 %v1259_v57, %v2995_v20 }
  0xc8   : > { %1306 = vmatprep.subr.mxu1 %v1281_v9  ;;  %719 = vmatpush1.msra.mxu0 %v647_v1  ;;  %v1055_v32 = vmul.f32 1.5, %v2997_v54  ;;  %v1277_v48 = vmax.f32 %v1269_v52, 0.0  ;;  %v1065_v49 = vadd.f32 %v1057_v18, %v2975_v53  ;;  %v1468_v36 = vmul.f32 2.5, %v2896_v21  ;;  %v3077_v9 = vld [vmem:[%s3902_s4 + $0x18] sm:$0xff] }
  0xc9   : > { %1307 = vmatpush1.msra.mxu1 %v1280_v60  ;;  %2395 = vmatmul.mubr.msk.f32.vlgmr.msra.gmra.mxu0 %vm675_vm0, %v3016_v58  ;;  %v1075_v45 = vmax.f32 %v1067_v22, 0.0  ;;  %v1266_v37 = vadd.f32 %v1258_v23, %v2993_v35  ;;  %v1064_v38 = vadd.f32 %v1056_v24, %v2995_v20  ;;  %v1276_v39 = vmax.f32 %v1268_v56, 0.0 }
  0xca   : > { %1103 = vmatprep.subr.mxu0 %v1078_v17  ;;  %1308 = vmatprep.subr.mxu1 %v1279_v59  ;;  %v1679_v40 = vadd.f32 %v1671_v26, %v2902_v34  ;;  %v1074_v41 = vmax.f32 %v1066_v30, 0.0  ;;  %v1275_v42 = vmax.f32 %v1267_v31, 0.0  ;;  %v1063_v3 = vadd.f32 %v1055_v32, %v2993_v35 }
  0xcb   : > { %950 = vmatprep.mubr.f32.mxu1 %v2677_v15  ;;  %1104 = vmatpush1.msra.mxu0 %v1077_v10  ;;  %v1073_v43 = vmax.f32 %v1065_v49, 0.0  ;;  %v1476_v44 = vadd.f32 %v1468_v36, %v2902_v34  ;;  %v1274_v46 = vmax.f32 %v1266_v37, 0.0  ;;  %v1072_v47 = vmax.f32 %v1064_v38, 0.0 }
  0xcc   : > { %1309 = vmatpush1.msra.mxu1 %v1278_v25  ;;  %1105 = vmatprep.subr.mxu0 %v1076_v29  ;;  %v1687_v62 = vmax.f32 %v1679_v40, 0.0  ;;  %v1071_v63 = vmax.f32 %v1063_v3, 0.0  ;;  %v1670_v0 = vmul.f32 3.0, %v2894_v28  ;;  %v1669_v50 = vmul.f32 3.0, %v2922_v6 }
  0xcd   : > { %2400 = vmatmul.mubr.msk.f32.gmra.mxu1 %vm675_vm0, %v3043_v27  ;;  %1310 = vmatprep.subr.mxu1 %v1277_v48  ;;  %v1484_v1 = vmax.f32 %v1476_v44, 0.0  ;;  %v1467_v7 = vmul.f32 2.5, %v2894_v28  ;;  %v2076_v8 = vmul.f32 4.0, %v2894_v28  ;;  %v1668_v51 = vmul.f32 3.0, %v2920_v5 }
  0xce   : > { %758 = vmatprep.mubr.f32.mxu0 %v2677_v15  ;;  %1106 = vmatpush1.msra.mxu0 %v1075_v45  ;;  %v1466_v14 = vmul.f32 2.5, %v2922_v6  ;;  %v1667_v57 = vmul.f32 3.0, %v2981_v13  ;;  %v1678_v17 = vadd.f32 %v1670_v0, %v2900_v33  ;;  %v1677_v52 = vadd.f32 %v1669_v50, %v2918_v4 }
  0xcf   : > { %1311 = vmatpush1.msra.mxu1 %v1276_v39  ;;  %2396 = vmatmul.mubr.msk.f32.gmra.mxu0 %vm675_vm0, %v3043_v27  ;;  %v3085_v60 = vadd.f32 %v2076_v8, %v2900_v33  ;;  %v1465_v18 = vmul.f32 2.5, %v2920_v5  ;;  %v1873_v59 = vmul.f32 3.5, %v2894_v28  ;;  %v1475_v22 = vadd.f32 %v1467_v7, %v2900_v33 }
  0xd0   : > { %1107 = vmatprep.subr.mxu0 %v1074_v41  ;;  %1312 = vmatprep.subr.mxu1 %v1275_v42  ;;  %v1666_v23 = vmul.f32 3.0, %v2979_v12  ;;  %v1676_v24 = vadd.f32 %v1668_v51, %v2916_v2  ;;  %v1464_v10 = vmul.f32 2.5, %v2981_v13  ;;  %v1665_v25 = vmul.f32 3.0, %v2999_v55 }
  0xd1   : > { %956 = vmatprep.mubr.f32.mxu1 %v2677_v15  ;;  %1108 = vmatpush1.msra.mxu0 %v1073_v43  ;;  %v3102_v56 = vadd.f32 %v1873_v59, %v2900_v33  ;;  %v1474_v28 = vadd.f32 %v1466_v14, %v2918_v4  ;;  %v1675_v26 = vadd.f32 %v1667_v57, %v2977_v11  ;;  %v1664_v29 = vmul.f32 3.0, %v2997_v54 }
  0xd2   : > { %1313 = vmatpush1.msra.mxu1 %v1274_v46  ;;  %1109 = vmatprep.subr.mxu0 %v1072_v47  ;;  %v1686_v30 = vmax.f32 %v1678_v17, 0.0  ;;  %v1685_v31 = vmax.f32 %v1677_v52, 0.0  ;;  %v1473_v32 = vadd.f32 %v1465_v18, %v2916_v2  ;;  %v1463_v48 = vmul.f32 2.5, %v2979_v12 }
  0xd3   : > { %2401 = vmatmul.mubr.msk.f32.gmra.mxu1 %vm675_vm0, %v3064_v61  ;;  %1712 = vmatprep.subr.mxu1 %v1687_v62  ;;  %v1483_v33 = vmax.f32 %v1475_v22, 0.0  ;;  %v1674_v49 = vadd.f32 %v1666_v23, %v2975_v53  ;;  %v1462_v36 = vmul.f32 2.5, %v2999_v55  ;;  %v2077_v45 = vmul.f32 4.0, %v2896_v21 }
  0xd4   : > { %764 = vmatprep.mubr.f32.mxu0 %v2677_v15  ;;  %1110 = vmatpush1.msra.mxu0 %v1071_v63  ;;  %v1684_v37 = vmax.f32 %v1676_v24, 0.0  ;;  %v1472_v38 = vadd.f32 %v1464_v10, %v2977_v11  ;;  %v1673_v39 = vadd.f32 %v1665_v25, %v2995_v20  ;;  %v1461_v40 = vmul.f32 2.5, %v2997_v54 }
  0xd5   : > { %2397 = vmatmul.mubr.msk.f32.gmra.mxu0 %vm675_vm0, %v3064_v61  ;;  %1509 = vmatprep.subr.mxu0 %v1484_v1  ;;  %v1482_v41 = vmax.f32 %v1474_v28, 0.0  ;;  %v1683_v42 = vmax.f32 %v1675_v26, 0.0  ;;  %v1672_v3 = vadd.f32 %v1664_v29, %v2993_v35  ;;  %v1874_v43 = vmul.f32 3.5, %v2896_v21 }
  0xd6   : > { %962 = vmatprep.mubr.f32.mxu1 %v2677_v15  ;;  %770 = vmatprep.mubr.f32.mxu0 %v2677_v15  ;;  %v1481_v44 = vmax.f32 %v1473_v32, 0.0  ;;  %v1471_v46 = vadd.f32 %v1463_v48, %v2975_v53  ;;  %v1682_v47 = vmax.f32 %v1674_v49, 0.0  ;;  %v1470_v62 = vadd.f32 %v1462_v36, %v2995_v20 }
  0xd7   : > { %2402 = vmatmul.mubr.msk.f32.gmra.mxu1 %vm675_vm0, %v3077_v9  ;;  %v2085_v63 = vadd.f32 %v2077_v45, %v2902_v34  ;;  %v1480_v0 = vmax.f32 %v1472_v38, 0.0  ;;  %v1681_v50 = vmax.f32 %v1673_v39, 0.0  ;;  %v1469_v21 = vadd.f32 %v1461_v40, %v2993_v35 }
  0xd8   : > { %1346 = vmatprep.mubr.f32.mxu1 %v2677_v15  ;;  %v1680_v1 = vmax.f32 %v1672_v3, 0.0  ;;  %v1882_v7 = vadd.f32 %v1874_v43, %v2902_v34  ;;  %v1479_v8 = vmax.f32 %v1471_v46, 0.0  ;;  %v1478_v51 = vmax.f32 %v1470_v62, 0.0  ;;  %v3221_v46 = vpop.permute.xlu0 %657 }
  0xd9   : > { %2398 = vmatmul.mubr.msk.f32.gmra.mxu0 %vm675_vm0, %v3077_v9  ;;  %v2093_v14 = vmax.f32 %v2085_v63, 0.0  ;;  %v1477_v57 = vmax.f32 %v1469_v21, 0.0  ;;  %v2075_v34 = vmul.f32 4.0, %v2922_v6  ;;  %v2074_v52 = vmul.f32 4.0, %v2920_v5 }
  0xda   : > { %1143 = vmatprep.mubr.f32.mxu0 %v2677_v15  ;;  %v1890_v17 = vmax.f32 %v1882_v7, 0.0  ;;  %v1872_v18 = vmul.f32 3.5, %v2922_v6  ;;  %v2073_v59 = vmul.f32 4.0, %v2981_v13  ;;  %v1871_v22 = vmul.f32 3.5, %v2920_v5 }
  0xdb   : > { %2407 = vmatmul.mubr.msk.f32.vlgmr.msra.gmra.mxu1 %vm675_vm0, %v3016_v58  ;;  %v2083_v23 = vadd.f32 %v2075_v34, %v2918_v4  ;;  %v2072_v24 = vmul.f32 4.0, %v2979_v12  ;;  %v2082_v10 = vadd.f32 %v2074_v52, %v2916_v2  ;;  %v1870_v25 = vmul.f32 3.5, %v2981_v13 }
  0xdc   : > { %1713 = vmatpush1.msra.mxu1 %v1686_v30  ;;  %1352 = vmatprep.mubr.f32.mxu1 %v2677_v15  ;;  %v2071_v6 = vmul.f32 4.0, %v2999_v55  ;;  %v1880_v5 = vadd.f32 %v1872_v18, %v2918_v4  ;;  %v2081_v28 = vadd.f32 %v2073_v59, %v2977_v11  ;;  %v2070_v26 = vmul.f32 4.0, %v2997_v54 }
  0xdd   : > { %1714 = vmatprep.subr.mxu1 %v1685_v31  ;;  %2403 = vmatmul.mubr.msk.f32.vlgmr.msra.gmra.mxu0 %vm675_vm0, %v3016_v58  ;;  %v2092_v29 = vmax.f32 %v3085_v60, 0.0  ;;  %v1879_v30 = vadd.f32 %v1871_v22, %v2916_v2  ;;  %v1869_v31 = vmul.f32 3.5, %v2979_v12  ;;  %v2091_v13 = vmax.f32 %v2083_v23, 0.0 }
  0xde   : > { %1510 = vmatpush1.msra.mxu0 %v1483_v33  ;;  %1715 = vmatpush1.msra.mxu1 %v1684_v37  ;;  %v1889_v32 = vmax.f32 %v3102_v56, 0.0  ;;  %v2080_v4 = vadd.f32 %v2072_v24, %v2975_v53  ;;  %v1868_v48 = vmul.f32 3.5, %v2999_v55  ;;  %v2090_v33 = vmax.f32 %v2082_v10, 0.0 }
  0xdf   : > { %1511 = vmatprep.subr.mxu0 %v1482_v41  ;;  %1716 = vmatprep.subr.mxu1 %v1683_v42  ;;  %v1878_v60 = vadd.f32 %v1870_v25, %v2977_v11  ;;  %v2079_v2 = vadd.f32 %v2071_v6, %v2995_v20  ;;  %v1867_v12 = vmul.f32 3.5, %v2997_v54  ;;  %v1888_v49 = vmax.f32 %v1880_v5, 0.0 }
  0xe0   : > { %2408 = vmatmul.mubr.msk.f32.gmra.mxu1 %vm675_vm0, %v3043_v27  ;;  %1512 = vmatpush1.msra.mxu0 %v1481_v44  ;;  %v2089_v56 = vmax.f32 %v2081_v28, 0.0  ;;  %v2078_v36 = vadd.f32 %v2070_v26, %v2993_v35  ;;  %v1887_v55 = vmax.f32 %v1879_v30, 0.0  ;;  %v1877_v45 = vadd.f32 %v1869_v31, %v2975_v53 }
  0xe1   : > { %1717 = vmatpush1.msra.mxu1 %v1682_v47  ;;  %1149 = vmatprep.mubr.f32.mxu0 %v2677_v15  ;;  %v2088_v11 = vmax.f32 %v2080_v4, 0.0  ;;  %v1876_v37 = vadd.f32 %v1868_v48, %v2995_v20  ;;  %v1886_v54 = vmax.f32 %v1878_v60, 0.0  ;;  %v2087_v38 = vmax.f32 %v2079_v2, 0.0 }
  0xe2   : > { %1513 = vmatprep.subr.mxu0 %v1480_v0  ;;  %1718 = vmatprep.subr.mxu1 %v1681_v50  ;;  %v1875_v39 = vadd.f32 %v1867_v12, %v2993_v35  ;;  %v2086_v40 = vmax.f32 %v2078_v36, 0.0  ;;  %v1885_v53 = vmax.f32 %v1877_v45, 0.0  ;;  %v3225_v0 = vpop.permute.xlu0 %667 }
  0xe3   : > { %2404 = vmatmul.mubr.msk.f32.gmra.mxu0 %vm675_vm0, %v3043_v27  ;;  %1719 = vmatpush1.msra.mxu1 %v1680_v1  ;;  %v1884_v20 = vmax.f32 %v1876_v37, 0.0 }
  0xe4   : > { %1514 = vmatpush1.msra.mxu0 %v1479_v8  ;;  %1358 = vmatprep.mubr.f32.mxu1 %v2677_v15  ;;  %v1883_v41 = vmax.f32 %v1875_v39, 0.0 }
  0xe5   : > { %1515 = vmatprep.subr.mxu0 %v1478_v51  ;;  %2118 = vmatprep.subr.mxu1 %v2093_v14 }
  0xe6   : > { %2409 = vmatmul.mubr.msk.f32.gmra.mxu1 %vm675_vm0, %v3064_v61  ;;  %1516 = vmatpush1.msra.mxu0 %v1477_v57  ;;  %v3233_v34 = vpop.permute.xlu0 %787 }
  0xe7   : > { %1155 = vmatprep.mubr.f32.mxu0 %v2677_v15  ;;  %1915 = vmatprep.subr.mxu0 %v1890_v17 }
  0xe8   : > { %2405 = vmatmul.mubr.msk.f32.gmra.mxu0 %vm675_vm0, %v3064_v61  ;;  %1364 = vmatprep.mubr.f32.mxu1 %v2677_v15 }
  0xe9   : > { %1161 = vmatprep.mubr.f32.mxu0 %v2677_v15 }
  0xea   : > { %2410 = vmatmul.mubr.msk.f32.gmra.mxu1 %vm675_vm0, %v3077_v9 }
  0xeb   : > { %1752 = vmatprep.mubr.f32.mxu1 %v2677_v15 }
  0xec   : > { %2406 = vmatmul.mubr.msk.f32.gmra.mxu0 %vm675_vm0, %v3077_v9 }
  0xed   : > { %1549 = vmatprep.mubr.f32.mxu0 %v2677_v15 }
  0xee   : > { %2415 = vmatmul.mubr.msk.f32.vlgmr.msra.gmra.mxu1 %vm675_vm0, %v3016_v58 }
  0xef   : > { %2119 = vmatpush1.msra.mxu1 %v2092_v29  ;;  %1758 = vmatprep.mubr.f32.mxu1 %v2677_v15 }
  0xf0   : > { %2120 = vmatprep.subr.mxu1 %v2091_v13  ;;  %2411 = vmatmul.mubr.msk.f32.vlgmr.msra.gmra.mxu0 %vm675_vm0, %v3016_v58 }
  0xf1   : > { %1916 = vmatpush1.msra.mxu0 %v1889_v32  ;;  %2121 = vmatpush1.msra.mxu1 %v2090_v33  ;;  %v3247_v32 = vpop.permute.xlu0 %797 }
  0xf2   : > { %1917 = vmatprep.subr.mxu0 %v1888_v49  ;;  %2122 = vmatprep.subr.mxu1 %v2089_v56 }
  0xf3   : > { %2416 = vmatmul.mubr.msk.f32.gmra.mxu1 %vm675_vm0, %v3043_v27  ;;  %1918 = vmatpush1.msra.mxu0 %v1887_v55 }
  0xf4   : > { %2123 = vmatpush1.msra.mxu1 %v2088_v11  ;;  %1555 = vmatprep.mubr.f32.mxu0 %v2677_v15 }
  0xf5   : > { %1919 = vmatprep.subr.mxu0 %v1886_v54  ;;  %2124 = vmatprep.subr.mxu1 %v2087_v38 }
  0xf6   : > { %2412 = vmatmul.mubr.msk.f32.gmra.mxu0 %vm675_vm0, %v3043_v27  ;;  %2125 = vmatpush1.msra.mxu1 %v2086_v40 }
  0xf7   : > { %1920 = vmatpush1.msra.mxu0 %v1885_v53  ;;  %1764 = vmatprep.mubr.f32.mxu1 %v2677_v15 }
  0xf8   : > { %1921 = vmatprep.subr.mxu0 %v1884_v20  ;;  %2417 = vmatmul.mubr.msk.f32.gmra.mxu1 %vm675_vm0, %v3064_v61 }
  0xf9   : > { %1922 = vmatpush1.msra.mxu0 %v1883_v41  ;;  %1561 = vmatprep.mubr.f32.mxu0 %v2677_v15 }
  0xfa   : > { %2413 = vmatmul.mubr.msk.f32.gmra.mxu0 %vm675_vm0, %v3064_v61  ;;  %1770 = vmatprep.mubr.f32.mxu1 %v2677_v15 }
  0xfb   : > { %1567 = vmatprep.mubr.f32.mxu0 %v2677_v15 }
  0xfc   : > { %2418 = vmatmul.mubr.msk.f32.gmra.mxu1 %vm675_vm0, %v3077_v9 }
  0xfd   : > { %2158 = vmatprep.mubr.f32.mxu1 %v2677_v15 }
  0xfe   : > { %2414 = vmatmul.mubr.msk.f32.gmra.mxu0 %vm675_vm0, %v3077_v9 }
  0xff   : > { %1955 = vmatprep.mubr.f32.mxu0 %v2677_v15 }
 0x100   : > { %2423 = vmatmul.mubr.msk.f32.vlgmr.msra.gmra.mxu1 %vm675_vm0, %v3016_v58 }
 0x101   : > { %2164 = vmatprep.mubr.f32.mxu1 %v2677_v15 }
 0x102   : > { %2419 = vmatmul.mubr.msk.f32.vlgmr.msra.gmra.mxu0 %vm675_vm0, %v3016_v58 }
 0x103   : > { %1961 = vmatprep.mubr.f32.mxu0 %v2677_v15 }
 0x104   : > { %2424 = vmatmul.mubr.msk.f32.gmra.mxu1 %vm675_vm0, %v3043_v27 }
 0x105   : > { %2170 = vmatprep.mubr.f32.mxu1 %v2677_v15 }
 0x106   : > { %2420 = vmatmul.mubr.msk.f32.gmra.mxu0 %vm675_vm0, %v3043_v27 }
 0x107   : > { %1967 = vmatprep.mubr.f32.mxu0 %v2677_v15 }
 0x108   : > { %2425 = vmatmul.mubr.msk.f32.gmra.mxu1 %vm675_vm0, %v3064_v61 }
 0x109   : > { %2176 = vmatprep.mubr.f32.mxu1 %v2677_v15 }
 0x10a   : > { %2421 = vmatmul.mubr.msk.f32.gmra.mxu0 %vm675_vm0, %v3064_v61  ;;  %v3223_v61 = vpop.permute.xlu1 %662 }
 0x10b   : > { %1973 = vmatprep.mubr.f32.mxu0 %v2677_v15 }
 0x10c   : > { %2426 = vmatmul.mubr.msk.f32.gmra.mxu1 %vm675_vm0, %v3077_v9 }
 0x10e   : > { %2422 = vmatmul.mubr.msk.f32.gmra.mxu0 %vm675_vm0, %v3077_v9  ;;  %v3228_v7 = vpop.permute.xlu1 %672 }
 0x112   : > { %v3241_v28 = vpop.permute.xlu1 %792 }
 0x116   : > { %v3261_v37 = vpop.permute.xlu1 %802 }
 0x187   : > { %v946_v35 = vpop.f32.mrf.mxu1 }
 0x188   : > { %v947_v36 = vadd.f32 %v946_v35, %v3221_v46 }
 0x189   : > { %v754_v58 = vpop.f32.mrf.mxu0  ;;  %v948_v27 = vpop.f32.mrf.mxu1 }
 0x18a   : > { %v949_v14 = vadd.f32 %v948_v27, %v3221_v46  ;;  %v755_v2 = vadd.f32 %v754_v58, %v3221_v46 }
 0x18b   : > { %v756_v42 = vpop.f32.mrf.mxu0 }
 0x18c   : > { %v757_v52 = vadd.f32 %v756_v42, %v3221_v46  ;;  %v970_v25 = vmax.f32 %v949_v14, 0.0  ;;  %v777_v42 = vmax.f32 %v755_v2, 0.0 }
 0x18d   : > { %v952_v3 = vpop.f32.mrf.mxu1 }
 0x18e   : > { %v778_v5 = vmax.f32 %v757_v52, 0.0  ;;  %v953_v4 = vadd.f32 %v952_v3, %v3223_v61  ;;  %v978_v12 = vmul.f32 %v970_v25, %v3233_v34 }
 0x18f   : > { %v760_v43 = vpop.f32.mrf.mxu0  ;;  %v954_v44 = vpop.f32.mrf.mxu1 }
 0x190   : > { %v955_v1 = vadd.f32 %v954_v44, %v3223_v61  ;;  %v761_v29 = vadd.f32 %v760_v43, %v3223_v61  ;;  %v806_v55 = vmul.f32 %v3233_v34, %v778_v5  ;;  %v971_v20 = vmax.f32 %v953_v4, 0.0 }
 0x191   : > { %v762_v47 = vpop.f32.mrf.mxu0  ;;  %v969_v44 = vmax.f32 %v947_v36, 0.0 }
 0x192   : > { %v763_v8 = vadd.f32 %v762_v47, %v3223_v61  ;;  %v972_v59 = vmax.f32 %v955_v1, 0.0  ;;  %v779_v54 = vmax.f32 %v761_v29, 0.0  ;;  %v979_v1 = vmul.f32 %v971_v20, %v3241_v28 }
 0x193   : > { %v958_v62 = vpop.f32.mrf.mxu1 }
 0x194   : > { %v780_v23 = vmax.f32 %v763_v8, 0.0  ;;  %v980_v30 = vmul.f32 %v972_v59, %v3241_v28  ;;  %v959_v45 = vadd.f32 %v958_v62, %v3225_v0 }
 0x195   : > { %v766_v15 = vpop.f32.mrf.mxu0  ;;  %v960_v63 = vpop.f32.mrf.mxu1 }
 0x196   : > { %v961_v57 = vadd.f32 %v960_v63, %v3225_v0  ;;  %v808_v48 = vmul.f32 %v3241_v28, %v780_v23  ;;  %v767_v49 = vadd.f32 %v766_v15, %v3225_v0  ;;  %v994_v38 = vadd.f32 %v980_v30, %v978_v12 }
 0x197   : > { %v768_v50 = vpop.f32.mrf.mxu0  ;;  %v964_v21 = vpop.f32.mrf.mxu1  ;;  %v973_v47 = vmax.f32 %v959_v45, 0.0  ;;  %v807_v15 = vmul.f32 %v3241_v28, %v779_v54 }
 0x198   : > { %v769_v18 = vadd.f32 %v768_v50, %v3225_v0  ;;  %v974_v6 = vmax.f32 %v961_v57, 0.0  ;;  %v822_v41 = vadd.f32 %v808_v48, %v806_v55  ;;  %v965_v35 = vadd.f32 %v964_v21, %v3228_v7 }
 0x199   : > { %v772_v9 = vpop.f32.mrf.mxu0  ;;  %v966_v51 = vpop.f32.mrf.mxu1  ;;  %v781_v3 = vmax.f32 %v767_v49, 0.0  ;;  %v805_v21 = vmul.f32 %v3233_v34, %v777_v42  ;;  %v981_v52 = vmul.f32 %v973_v47, %v3247_v32 }
 0x19a   : > { %v967_v22 = vadd.f32 %v966_v51, %v3228_v7  ;;  %v782_v26 = vmax.f32 %v769_v18, 0.0  ;;  %v982_v56 = vmul.f32 %v974_v6, %v3247_v32  ;;  %v773_v39 = vadd.f32 %v772_v9, %v3228_v7 }
 0x19b   : > { %v774_v17 = vpop.f32.mrf.mxu0  ;;  %v3239_v10 = vpop.f32.mrf.mxu1  ;;  %v975_v8 = vmax.f32 %v965_v35, 0.0  ;;  %v809_v57 = vmul.f32 %v3247_v32, %v781_v3  ;;  %v813_v18 = vadd.f32 %v807_v15, %v805_v21 }
 0x19c   : > { %v775_v24 = vadd.f32 %v774_v17, %v3228_v7  ;;  %v976_v31 = vmax.f32 %v967_v22, 0.0  ;;  %v810_v11 = vmul.f32 %v3247_v32, %v782_v26  ;;  %v995_v43 = vadd.f32 %v994_v38, %v982_v56 }
 0x19d   : > { %v3245_v13 = vpop.f32.mrf.mxu0  ;;  %v3251_v60 = vpop.f32.mrf.mxu1  ;;  %v783_v63 = vmax.f32 %v773_v39, 0.0  ;;  %v977_v17 = vmul.f32 %v969_v44, %v3233_v34  ;;  %v983_v5 = vmul.f32 %v975_v8, %v3261_v37  ;;  %v814_v26 = vadd.f32 %v813_v18, %v809_v57 }
 0x19e   : > { %v784_v33 = vmax.f32 %v775_v24, 0.0  ;;  %v984_v40 = vmul.f32 %v976_v31, %v3261_v37  ;;  %v823_v62 = vadd.f32 %v822_v41, %v810_v11  ;;  %v1349_v45 = vadd.f32 %v3239_v10, %v3221_v46 }
 0x19f   : > { %v3265_v53 = vpop.f32.mrf.mxu0  ;;  %v811_v23 = vmul.f32 %v3261_v37, %v783_v63  ;;  %v985_v24 = vadd.f32 %v979_v1, %v977_v17  ;;  %v1146_v10 = vadd.f32 %v3245_v13, %v3221_v46 }
 0x1a0   : > { %v812_v58 = vmul.f32 %v3261_v37, %v784_v33  ;;  %v1354_v27 = vpop.f32.mrf.mxu1  ;;  %v996_v50 = vadd.f32 %v995_v43, %v984_v40 }
 0x1a1   : > { %v986_v29 = vadd.f32 %v985_v24, %v981_v52  ;;  %v815_v4 = vadd.f32 %v814_v26, %v811_v23  ;;  %v1355_v12 = vadd.f32 %v1354_v27, %v3223_v61  ;;  %v1371_v27 = vmax.f32 %v1349_v45, 0.0 }
 0x1a2   : > { %v824_v51 = vadd.f32 %v823_v62, %v812_v58  ;;  %v3271_v14 = vpop.f32.mrf.mxu1  ;;  %v997_v59 = vrot.slane %v996_v50, 4  ;;  %v1168_v52 = vmax.f32 %v1146_v10, 0.0 }
 0x1a3   : > { %v1151_v9 = vpop.f32.mrf.mxu0  ;;  %v987_v2 = vadd.f32 %v986_v29, %v983_v5  ;;  %v816_v36 = vrot.slane %v815_v4, 4  ;;  %v1373_v39 = vmax.f32 %v1355_v12, 0.0  ;;  %v1351_v12 = vadd.f32 %v3251_v60, %v3221_v46 }
 0x1a4   : > { %v825_v25 = vrot.slane %v824_v51, 4  ;;  %v998_v30 = vadd.f32 %v997_v59, %v996_v50  ;;  %v1152_v3 = vadd.f32 %v1151_v9, %v3223_v61 }
 0x1a5   : > { %v3277_v22 = vpop.f32.mrf.mxu0  ;;  %v988_v54 = vrot.slane %v987_v2, 4  ;;  %v817_v41 = vadd.f32 %v816_v36, %v815_v4  ;;  %v1381_v44 = vmul.f32 %v1373_v39, %v3241_v28 }
 0x1a6   : > { %v1360_v6 = vpop.f32.mrf.mxu1  ;;  %v826_v48 = vadd.f32 %v825_v25, %v824_v51  ;;  %v999_v49 = vrot.slane %v998_v30, 2  ;;  %v1379_v51 = vmul.f32 %v1371_v27, %v3233_v34  ;;  %v1170_v57 = vmax.f32 %v1152_v3, 0.0 }
 0x1a7   : > { %v1361_v38 = vadd.f32 %v1360_v6, %v3225_v0  ;;  %v989_v42 = vadd.f32 %v988_v54, %v987_v2  ;;  %v818_v63 = vrot.slane %v817_v41, 2  ;;  %v1176_v2 = vmul.f32 %v1168_v52, %v3233_v34 }
 0x1a8   : > { %v1157_v31 = vpop.f32.mrf.mxu0  ;;  %v1362_v33 = vpop.f32.mrf.mxu1  ;;  %v827_v55 = vrot.slane %v826_v48, 2  ;;  %v1000_v40 = vadd.f32 %v999_v49, %v998_v30  ;;  %v1387_v13 = vadd.f32 %v1381_v44, %v1379_v51  ;;  %v1178_v29 = vmul.f32 %v1170_v57, %v3241_v28 }
 0x1a9   : > { %v1375_v43 = vmax.f32 %v1361_v38, 0.0  ;;  %v1158_v62 = vadd.f32 %v1157_v31, %v3225_v0  ;;  %v990_v21 = vrot.slane %v989_v42, 2  ;;  %v819_v24 = vadd.f32 %v818_v63, %v817_v41 }
 0x1aa   : > { %v3282_v56 = vpop.f32.mrf.mxu0  ;;  %v1366_v11 = vpop.f32.mrf.mxu1  ;;  %v828_v58 = vadd.f32 %v827_v55, %v826_v48  ;;  %v1001_v47 = vrot.slane %v1000_v40, 1  ;;  %v1357_v30 = vadd.f32 %v3271_v14, %v3223_v61  ;;  %v3304_v48 = vstv %s352_s24 }
 0x1ab   : > { %v1367_v20 = vadd.f32 %v1366_v11, %v3228_v7  ;;  %v1383_v9 = vmul.f32 %v1375_v43, %v3247_v32  ;;  %v1172_v59 = vmax.f32 %v1158_v62, 0.0  ;;  %v991_v26 = vadd.f32 %v990_v21, %v989_v42 }
 0x1ac   : > { %v1163_v35 = vpop.f32.mrf.mxu0  ;;  %v1368_v50 = vpop.f32.mrf.mxu1  ;;  %v829_v8 = vrot.slane %v828_v58, 1  ;;  %v1002_v18 = vadd.f32 %v1001_v47, %v1000_v40  ;;  %v1363_v49 = vadd.f32 %v1362_v33, %v3225_v0  ;;  %v820_v11 = vrot.slane %v819_v24, 1 }
 0x1ad   : > { %v1377_v15 = vmax.f32 %v1367_v20, 0.0  ;;  %v1164_v17 = vadd.f32 %v1163_v35, %v3228_v7  ;;  %v1388_v31 = vadd.f32 %v1387_v13, %v1383_v9  ;;  %v1180_v55 = vmul.f32 %v1172_v59, %v3247_v32 }
 0x1ae   : > { %v1165_v1 = vpop.f32.mrf.mxu0  ;;  %v3297_v25 = vpop.f32.mrf.mxu1  ;;  %v830_v5 = vadd.f32 %v829_v8, %v828_v58  ;;  %v3311_v36 = vadd.f32 %v1002_v18, %v3304_v48  ;;  %v1154_v39 = vadd.f32 %v3277_v22, %v3223_v61  ;;  %v992_v60 = vrot.slane %v991_v26, 1 }
 0x1af   : > { %v1385_v23 = vmul.f32 %v1377_v15, %v3261_v37  ;;  %v1174_v4 = vmax.f32 %v1164_v17, 0.0  ;;  %v1184_v40 = vadd.f32 %v1178_v29, %v1176_v2  ;;  %v1374_v33 = vmax.f32 %v1357_v30, 0.0 }
 0x1b0   : > { %v3299_v6 = vpop.f32.mrf.mxu0  ;;  %v3314_v54 = vpop.f32.mrf.mxu1  ;;  %v3319_v38 = vadd.f32 %v3304_v48, %v830_v5  ;;  %v1369_v41 = vadd.f32 %v1368_v50, %v3228_v7  ;;  %v1372_v35 = vmax.f32 %v1351_v12, 0.0  ;;  %v1148_v58 = vadd.f32 %v3265_v53, %v3221_v46 }
 0x1b1   : > { %v1389_v45 = vadd.f32 %v1388_v31, %v1385_v23  ;;  %v1182_v20 = vmul.f32 %v1174_v4, %v3261_v37  ;;  %v1376_v27 = vmax.f32 %v1363_v49, 0.0  ;;  %v1160_v42 = vadd.f32 %v3282_v56, %v3225_v0 }
 0x1b2   : > { %v3316_v14 = vpop.f32.mrf.mxu0  ;;  %v1008_v3 = vand.u32 2147483647, %v3311_v36  ;;  %v1185_v43 = vadd.f32 %v1184_v40, %v1180_v55  ;;  %v821_v22 = vadd.f32 %v820_v11, %v819_v24  ;;  %v837_v62 = vand.u32 2147483647, %v3319_v38 }
 0x1b3   : > { %v1390_v10 = vrot.slane %v1389_v45, 4  ;;  %v1760_v44 = vpop.f32.mrf.mxu1  ;;  %v1171_v15 = vmax.f32 %v1154_v39, 0.0  ;;  %v993_v63 = vadd.f32 %v992_v60, %v991_v26  ;;  %v1382_v50 = vmul.f32 %v1374_v33, %v3241_v28 }
 0x1b4   : > { %v1186_v8 = vadd.f32 %v1185_v43, %v1182_v20  ;;  %v1378_v51 = vmax.f32 %v1369_v41, 0.0  ;;  %v1166_v53 = vadd.f32 %v1165_v1, %v3228_v7  ;;  %v1380_v21 = vmul.f32 %v1372_v35, %v3233_v34 }
 0x1b5   : > { %v1169_v56 = vmax.f32 %v1148_v58, 0.0  ;;  %v1173_v57 = vmax.f32 %v1160_v42, 0.0  ;;  %v1010_v9 = vsub.f32 0.0, %v1008_v3  ;;  %v1384_v17 = vmul.f32 %v1376_v27, %v3247_v32  ;;  %v3338_v18 = vpop.f32.mrf.mxu1 }
 0x1b6   : > { %v1557_v47 = vpop.f32.mrf.mxu0  ;;  %v1391_v52 = vadd.f32 %v1390_v10, %v1389_v45  ;;  %v3336_v13 = vadd.f32 %v3304_v48, %v821_v22  ;;  %v839_v23 = vsub.f32 0.0, %v837_v62  ;;  %v1179_v24 = vmul.f32 %v1171_v15, %v3241_v28 }
 0x1b7   : > { %v3344_v1 = vadd.f32 %v993_v63, %v3304_v48  ;;  %v1396_v5 = vadd.f32 %v1382_v50, %v1380_v21  ;;  %v1187_v26 = vrot.slane %v1186_v8, 4  ;;  %v1386_v29 = vmul.f32 %v1378_v51, %v3261_v37 }
 0x1b8   : > { %v3340_v59 = vpop.f32.mrf.mxu0  ;;  %v1175_v30 = vmax.f32 %v1166_v53, 0.0  ;;  %v1177_v31 = vmul.f32 %v1169_v56, %v3233_v34  ;;  %v1181_v4 = vmul.f32 %v1173_v57, %v3247_v32  ;;  %v1013_v2 = vmul.f32 1.442695, %v1010_v9  ;;  %v1766_v45 = vpop.f32.mrf.mxu1 }
 0x1b9   : > { %v1397_v12 = vadd.f32 %v1396_v5, %v1384_v17  ;;  %v1392_v49 = vrot.slane %v1391_v52, 2  ;;  %v836_v55 = vand.u32 2147483647, %v3336_v13  ;;  %v842_v39 = vmul.f32 1.442695, %v839_v23 }
 0x1ba   : > { %v1563_v11 = vpop.f32.mrf.mxu0  ;;  %v1193_v60 = vadd.f32 %v1179_v24, %v1177_v31  ;;  %v1007_v40 = vand.u32 2147483647, %v3344_v1  ;;  %v1188_v33 = vadd.f32 %v1187_v26, %v1186_v8  ;;  %v1183_v41 = vmul.f32 %v1175_v30, %v3261_v37  ;;  %v1768_v43 = vpop.f32.mrf.mxu1 }
 0x1bb   : > { %v1398_v20 = vadd.f32 %v1397_v12, %v1386_v29  ;;  %v1558_v58 = vadd.f32 %v1557_v47, %v3223_v61  ;;  %2488 = vpow2.f32 %v1013_v2  ;;  %v1393_v27 = vadd.f32 %v1392_v49, %v1391_v52 }
 0x1bc   : > { %v1194_v35 = vadd.f32 %v1193_v60, %v1181_v4  ;;  %v838_v42 = vsub.f32 0.0, %v836_v55  ;;  %v1755_v3 = vadd.f32 %v3297_v25, %v3221_v46  ;;  %v1565_v10 = vpop.f32.mrf.mxu0  ;;  %2490 = vpow2.f32 %v842_v39  ;;  %v1772_v57 = vpop.f32.mrf.mxu1 }
 0x1bd   : > { %v1009_v22 = vsub.f32 0.0, %v1007_v40  ;;  %v1552_v62 = vadd.f32 %v3299_v6, %v3221_v46  ;;  %v1564_v15 = vadd.f32 %v1563_v11, %v3225_v0  ;;  %v1189_v63 = vrot.slane %v1188_v33, 2 }
 0x1be   : > { %v1399_v50 = vrot.slane %v1398_v20, 4  ;;  %v1195_v8 = vadd.f32 %v1194_v35, %v1183_v41  ;;  %v1761_v47 = vadd.f32 %v1760_v44, %v3223_v61  ;;  %v1576_v51 = vmax.f32 %v1558_v58, 0.0  ;;  %v1569_v25 = vpop.f32.mrf.mxu0 }
 0x1bf   : > { %v1394_v53 = vrot.slane %v1393_v27, 1  ;;  %v840_v21 = vmul.f32 1.442695, %v838_v42  ;;  %v1777_v56 = vmax.f32 %v1755_v3, 0.0  ;;  %v1011_v9 = vmul.f32 1.442695, %v1009_v22  ;;  %v1774_v42 = vpop.f32.mrf.mxu1 }
 0x1c0   : > { %v1574_v17 = vmax.f32 %v1552_v62, 0.0  ;;  %v1767_v52 = vadd.f32 %v1766_v45, %v3225_v0  ;;  %v1578_v23 = vmax.f32 %v1564_v15, 0.0  ;;  %v1190_v24 = vadd.f32 %v1189_v63, %v1188_v33 }
 0x1c1   : > { %v1400_v6 = vadd.f32 %v1399_v50, %v1398_v20  ;;  %v1196_v5 = vrot.slane %v1195_v8, 4  ;;  %v1779_v26 = vmax.f32 %v1761_v47, 0.0  ;;  %v1584_v29 = vmul.f32 %v1576_v51, %v3241_v28 }
 0x1c2   : > { %v1773_v30 = vadd.f32 %v1772_v57, %v3228_v7  ;;  %v1570_v44 = vadd.f32 %v1569_v25, %v3228_v7  ;;  %v1395_v31 = vadd.f32 %v1394_v53, %v1393_v27  ;;  %2492 = vpow2.f32 %v840_v21 }
 0x1c3   : > { %v1785_v4 = vmul.f32 %v1777_v56, %v3233_v34  ;;  %v1757_v2 = vadd.f32 %v3314_v54, %v3221_v46  ;;  %2494 = vpow2.f32 %v1011_v9  ;;  %v1582_v12 = vmul.f32 %v1574_v17, %v3233_v34 }
 0x1c4   : > { %v1781_v49 = vmax.f32 %v1767_v52, 0.0  ;;  %v1586_v55 = vmul.f32 %v1578_v23, %v3247_v32  ;;  %v1191_v45 = vrot.slane %v1190_v24, 1  ;;  %v1401_v11 = vrot.slane %v1400_v6, 2 }
 0x1c5   : > { %v1197_v39 = vadd.f32 %v1196_v5, %v1195_v8  ;;  %v1787_v60 = vmul.f32 %v1779_v26, %v3241_v28  ;;  %v1590_v40 = vadd.f32 %v1584_v29, %v1582_v12  ;;  %v1763_v33 = vadd.f32 %v3338_v18, %v3223_v61  ;;  %v1571_v29 = vpop.f32.mrf.mxu0 }
 0x1c6   : > { %v1783_v20 = vmax.f32 %v1773_v30, 0.0  ;;  %v1580_v41 = vmax.f32 %v1570_v44, 0.0  ;;  %v3372_v35 = vadd.f32 %v1395_v31, %v3304_v48  ;;  %v1778_v54 = vmax.f32 %v1757_v2, 0.0 }
 0x1c7   : > { %v1554_v58 = vadd.f32 %v3316_v14, %v3221_v46  ;;  %v1560_v27 = vadd.f32 %v3340_v59, %v3223_v61  ;;  %v1789_v22 = vmul.f32 %v1781_v49, %v3247_v32  ;;  %v1591_v62 = vadd.f32 %v1590_v40, %v1586_v55 }
 0x1c8   : > { %v3378_v3 = vpop.eup %2488  ;;  %v1769_v18 = vadd.f32 %v1768_v43, %v3225_v0  ;;  %v1588_v15 = vmul.f32 %v1580_v41, %v3261_v37  ;;  %v1192_v50 = vadd.f32 %v1191_v45, %v1190_v24  ;;  %v1198_v8 = vrot.slane %v1197_v39, 2 }
 0x1c9   : > { %v3383_v63 = vpop.eup %2490  ;;  %v1793_v47 = vadd.f32 %v1787_v60, %v1785_v4  ;;  %v1566_v14 = vadd.f32 %v1565_v10, %v3225_v0  ;;  %v1780_v51 = vmax.f32 %v1763_v33, 0.0  ;;  %v1791_v59 = vmul.f32 %v1783_v20, %v3261_v37 }
 0x1ca   : > { %v1592_v53 = vadd.f32 %v1591_v62, %v1588_v15  ;;  %v1775_v21 = vadd.f32 %v1774_v42, %v3228_v7  ;;  %v1024_v56 = vadd.f32 1.0, %v3378_v3  ;;  %v1409_v57 = vand.u32 2147483647, %v3372_v35 }
 0x1cb   : > { %v1402_v43 = vadd.f32 %v1401_v11, %v1400_v6  ;;  %v1577_v25 = vmax.f32 %v1560_v27, 0.0  ;;  %v853_v9 = vadd.f32 1.0, %v3383_v63  ;;  %v1575_v17 = vmax.f32 %v1554_v58, 0.0 }
 0x1cc   : > { %v1794_v52 = vadd.f32 %v1793_v47, %v1789_v22  ;;  %v1782_v23 = vmax.f32 %v1769_v18, 0.0  ;;  %v3392_v24 = vadd.f32 %v1192_v50, %v3304_v48  ;;  %v1199_v10 = vadd.f32 %v1198_v8, %v1197_v39 }
 0x1cd   : > { %v1579_v5 = vmax.f32 %v1566_v14, 0.0  ;;  %v1593_v26 = vrot.slane %v1592_v53, 4  ;;  %v1786_v30 = vmul.f32 %v1778_v54, %v3233_v34  ;;  %v1788_v44 = vmul.f32 %v1780_v51, %v3241_v28 }
 0x1ce   : > { %v1795_v31 = vadd.f32 %v1794_v52, %v1791_v59  ;;  %v1784_v4 = vmax.f32 %v1775_v21, 0.0  ;;  %2496 = vlog2.f32 %v1024_v56  ;;  %v1403_v6 = vrot.slane %v1402_v43, 1 }
 0x1cf   : > { %v1585_v2 = vmul.f32 %v1577_v25, %v3241_v28  ;;  %v1594_v12 = vadd.f32 %v1593_v26, %v1592_v53  ;;  %v3397_v49 = vpop.eup %2492  ;;  %2498 = vlog2.f32 %v853_v9  ;;  %v1411_v55 = vsub.f32 0.0, %v1409_v57 }
 0x1d0   : > { %v1790_v45 = vmul.f32 %v1782_v23, %v3247_v32  ;;  %v1572_v11 = vadd.f32 %v1571_v29, %v3228_v7  ;;  %v3401_v39 = vpop.eup %2494  ;;  %v1206_v60 = vand.u32 2147483647, %v3392_v24  ;;  %v1200_v40 = vrot.slane %v1199_v10, 1 }
 0x1d1   : > { %v1583_v33 = vmul.f32 %v1575_v17, %v3233_v34  ;;  %v1587_v20 = vmul.f32 %v1579_v5, %v3247_v32  ;;  %v1802_v41 = vadd.f32 %v1788_v44, %v1786_v30  ;;  %v1796_v54 = vrot.slane %v1795_v31, 4  ;;  %v3419_v5 = vpop.f32.mrf.mxu0 }
 0x1d2   : > { %v1792_v58 = vmul.f32 %v1784_v4, %v3261_v37  ;;  %v1581_v27 = vmax.f32 %v1572_v11, 0.0  ;;  %v1595_v22 = vrot.slane %v1594_v12, 2  ;;  %v1413_v62 = vmul.f32 1.442695, %v1411_v55 }
 0x1d3   : > { %v1599_v42 = vadd.f32 %v1585_v2, %v1583_v33  ;;  %v1404_v18 = vadd.f32 %v1403_v6, %v1402_v43  ;;  %v1803_v15 = vadd.f32 %v1802_v41, %v1790_v45  ;;  %v1208_v8 = vsub.f32 0.0, %v1206_v60  ;;  %v3415_v43 = vpop.f32.mrf.mxu1 }
 0x1d4   : > { %v1589_v50 = vmul.f32 %v1581_v27, %v3261_v37  ;;  %v1201_v47 = vadd.f32 %v1200_v40, %v1199_v10  ;;  %v1797_v51 = vadd.f32 %v1796_v54, %v1795_v31  ;;  %v1596_v53 = vadd.f32 %v1595_v22, %v1594_v12  ;;  %v3433_v54 = vpop.f32.mrf.mxu0 }
 0x1d5   : > { %v1600_v14 = vadd.f32 %v1599_v42, %v1587_v20  ;;  %v1804_v59 = vadd.f32 %v1803_v15, %v1792_v58  ;;  %2500 = vpow2.f32 %v1413_v62  ;;  %v844_v56 = vadd.f32 1.0, %v3397_v49  ;;  %v3429_v60 = vpop.f32.mrf.mxu1 }
 0x1d6   : > { %v3410_v57 = vadd.f32 %v1404_v18, %v3304_v48  ;;  %v1210_v25 = vmul.f32 1.442695, %v1208_v8  ;;  %v3413_v9 = vadd.f32 %v1201_v47, %v3304_v48  ;;  %v835_v17 = vmax.f32 %v3319_v38, 0.0 }
 0x1d7   : > { %v1601_v21 = vadd.f32 %v1600_v14, %v1589_v50  ;;  %v1006_v52 = vmax.f32 %v3311_v36, 0.0  ;;  %v1798_v23 = vrot.slane %v1797_v51, 2  ;;  %v1805_v10 = vrot.slane %v1804_v59, 4 }
 0x1d8   : > { %v1027_v26 = vmul.f32 -0.5, %v3378_v3  ;;  %v834_v29 = vmax.f32 %v3336_v13, 0.0  ;;  %v1597_v30 = vrot.slane %v1596_v53, 1  ;;  %v856_v4 = vmul.f32 -0.5, %v3383_v63 }
 0x1d9   : > { %v1602_v44 = vrot.slane %v1601_v21, 4  ;;  %2502 = vlog2.f32 %v844_v56  ;;  %v1015_v6 = vadd.f32 1.0, %v3401_v39  ;;  %v1410_v2 = vand.u32 2147483647, %v3410_v57 }
 0x1da   : > { %v1030_v55 = vand.u32 2147483647, %v3378_v3  ;;  %2504 = vpow2.f32 %v1210_v25  ;;  %v1207_v11 = vand.u32 2147483647, %v3413_v9  ;;  %v859_v40 = vand.u32 2147483647, %v3383_v63 }
 0x1db   : > { %v2497_v31 = vpop.eup %2496  ;;  %v1799_v20 = vadd.f32 %v1798_v23, %v1797_v51  ;;  %v1806_v41 = vadd.f32 %v1805_v10, %v1804_v59  ;;  %v847_v58 = vmul.f32 -0.5, %v3397_v49  ;;  %v1018_v27 = vmul.f32 -0.5, %v3401_v39  ;;  %v2166_v51 = vpop.f32.mrf.mxu1 }
 0x1dc   : > { %v2499_v12 = vpop.eup %2498  ;;  %v1598_v42 = vadd.f32 %v1597_v30, %v1596_v53  ;;  %v1603_v22 = vadd.f32 %v1602_v44, %v1601_v21  ;;  %v857_v62 = vadd.f32 1.0, %v856_v4  ;;  %v1028_v18 = vadd.f32 1.0, %v1027_v26  ;;  %v1963_v10 = vpop.f32.mrf.mxu0 }
 0x1dd   : > { %2506 = vlog2.f32 %v1015_v6  ;;  %v1412_v15 = vsub.f32 0.0, %v1410_v2  ;;  %vm3437_vm1 = vcmp.lt.f32.partialorder %v1030_v55, 0.0004427343  ;;  %v850_v8 = vand.u32 2147483647, %v3397_v49 }
 0x1de   : > { %v1209_v47 = vsub.f32 0.0, %v1207_v11  ;;  %v1604_v14 = vrot.slane %v1603_v22, 2  ;;  %v855_v59 = vmul.f32 0.6931472, %v2499_v12  ;;  %v1026_v56 = vmul.f32 0.6931472, %v2497_v31 }
 0x1df   : > { %v1800_v25 = vrot.slane %v1799_v20, 1  ;;  %v1807_v23 = vrot.slane %v1806_v41, 2  ;;  %v848_v53 = vadd.f32 1.0, %v847_v58  ;;  %v1019_v21 = vadd.f32 1.0, %v1018_v27  ;;  %v2168_v27 = vpop.f32.mrf.mxu1 }
 0x1e0   : > { %v3443_v26 = vadd.f32 %v1598_v42, %v3304_v48  ;;  %v1605_v30 = vadd.f32 %v1604_v14, %v1603_v22  ;;  %v858_v44 = vmul.f32 %v3383_v63, %v857_v62  ;;  %vm3446_vm2 = vcmp.lt.f32.partialorder %v859_v40, 0.0004427343  ;;  %v3459_v62 = vpop.f32.mrf.mxu0 }
 0x1e1   : > { %v1029_v6 = vmul.f32 %v3378_v3, %v1028_v18  ;;  %v1415_v2 = vmul.f32 1.442695, %v1412_v15  ;;  %v1021_v31 = vand.u32 2147483647, %v3401_v39  ;;  %v1212_v11 = vmul.f32 1.442695, %v1209_v47 }
 0x1e2   : > { %v3451_v12 = vpop.eup %2500  ;;  %v1606_v58 = vrot.slane %v1605_v30, 1  ;;  %v861_v42 = vsel %vm3446_vm2, %v858_v44, %v855_v59  ;;  %v1801_v40 = vadd.f32 %v1800_v25, %v1799_v20  ;;  %v1808_v22 = vadd.f32 %v1807_v23, %v1806_v41  ;;  %v2172_v25 = vpop.f32.mrf.mxu1 }
 0x1e3   : > { %v1032_v63 = vsel %vm3437_vm1, %v1029_v6, %v1026_v56  ;;  %v3462_v3 = vmul.f32 %v3397_v49, %v848_v53  ;;  %vm3464_vm3 = vcmp.lt.f32.partialorder %v850_v8, 0.0004427343  ;;  %v3469_v15 = vmul.f32 %v3401_v39, %v1019_v21 }
 0x1e4   : > { %v1612_v14 = vand.u32 2147483647, %v3443_v26  ;;  %v1417_v50 = vadd.f32 1.0, %v3451_v12  ;;  %v1420_v20 = vmul.f32 -0.5, %v3451_v12  ;;  %2508 = vpow2.f32 %v1415_v2 }
 0x1e5   : > { %v3478_v8 = vadd.f32 %v861_v42, %v835_v17  ;;  %v3482_v59 = vadd.f32 %v1032_v63, %v1006_v52  ;;  %2510 = vpow2.f32 %v1212_v11  ;;  %v1607_v56 = vadd.f32 %v1606_v58, %v1605_v30  ;;  %v1969_v17 = vpop.f32.mrf.mxu0 }
 0x1e6   : > { %v2503_v49 = vpop.eup %2502  ;;  %v3487_v53 = vadd.f32 %v1801_v40, %v3304_v48  ;;  %v1809_v21 = vrot.slane %v1808_v22, 1  ;;  %v2161_v44 = vadd.f32 %v3415_v43, %v3221_v46  ;;  %v1958_v38 = vadd.f32 %v3419_v5, %v3221_v46 }
 0x1e7   : > { %v3484_v23 = vpop.eup %2504  ;;  %v1614_v4 = vsub.f32 0.0, %v1612_v14  ;;  %v2163_v36 = vadd.f32 %v3429_v60, %v3221_v46  ;;  %v2167_v52 = vadd.f32 %v2166_v51, %v3223_v61  ;;  %v1964_v30 = vadd.f32 %v1963_v10, %v3223_v61  ;;  %v2174_v10 = vpop.f32.mrf.mxu1 }
 0x1e8   : > { %2512 = vlog2.f32 %v1417_v50  ;;  %v3497_v6 = vadd.f32 1.0, %v1420_v20  ;;  %v3499_v2 = vmul.f32 0.6931472, %v2503_v49  ;;  %v2169_v11 = vadd.f32 %v2168_v27, %v3223_v61  ;;  %v1971_v50 = vpop.f32.mrf.mxu0 }
 0x1e9   : > { %v3504_v5 = vmax.f32 %v3478_v8, %v3482_v59  ;;  %v1214_v58 = vadd.f32 1.0, %v3484_v23  ;;  %v3508_v60 = vadd.f32 %v1607_v56, %v3304_v48  ;;  %v2173_v51 = vadd.f32 %v2172_v25, %v3225_v0 }
 0x1ea   : > { %v2507_v43 = vpop.eup %2506  ;;  %v1815_v42 = vand.u32 2147483647, %v3487_v53  ;;  %v1810_v63 = vadd.f32 %v1809_v21, %v1808_v22  ;;  %v2183_v40 = vmax.f32 %v2161_v44, 0.0  ;;  %v1980_v14 = vmax.f32 %v1958_v38, 0.0  ;;  %v2178_v38 = vpop.f32.mrf.mxu1 }
 0x1eb   : > { %v1616_v27 = vmul.f32 1.442695, %v1614_v4  ;;  %v2184_v20 = vmax.f32 %v2163_v36, 0.0  ;;  %v2185_v49 = vmax.f32 %v2167_v52, 0.0  ;;  %v1982_v16 = vmax.f32 %v1964_v30, 0.0 }
 0x1ec   : > { %v3516_v56 = vmul.f32 0.6931472, %v2507_v43  ;;  %v2186_v33 = vmax.f32 %v2169_v11, 0.0  ;;  %v1970_v25 = vadd.f32 %v1969_v17, %v3225_v0  ;;  %2514 = vlog2.f32 %v1214_v58  ;;  %v1975_v11 = vpop.f32.mrf.mxu0 }
 0x1ed   : > { %v1613_v22 = vand.u32 2147483647, %v3508_v60  ;;  %v3522_v21 = vadd.f32 %v3433_v54, %v3221_v46  ;;  %v2187_v44 = vmax.f32 %v2173_v51, 0.0  ;;  %v1817_v4 = vsub.f32 0.0, %v1815_v42 }
 0x1ee   : > { %v3525_v36 = vadd.f32 %v1810_v63, %v3304_v48  ;;  %v2191_v52 = vmul.f32 %v2183_v40, %v3233_v34  ;;  %v1988_v30 = vmul.f32 %v1980_v14, %v3233_v34  ;;  %2516 = vpow2.f32 %v1616_v27  ;;  %v1977_v45 = vpop.f32.mrf.mxu0 }
 0x1ef   : > { %v2192_v17 = vmul.f32 %v2184_v20, %v3233_v34  ;;  %v2193_v43 = vmul.f32 %v2185_v49, %v3241_v28  ;;  %v1990_v58 = vmul.f32 %v1982_v16, %v3241_v28  ;;  %v2194_v46 = vmul.f32 %v2186_v33, %v3241_v28  ;;  %v2180_v49 = vpop.f32.mrf.mxu1 }
 0x1f0   : > { %v1966_v54 = vadd.f32 %v3459_v62, %v3223_v61  ;;  %v1984_v51 = vmax.f32 %v1970_v25, 0.0  ;;  %v2175_v42 = vadd.f32 %v2174_v10, %v3225_v0  ;;  %v1615_v40 = vsub.f32 0.0, %v1613_v22 }
 0x1f1   : > { %v3536_v63 = vpop.eup %2508  ;;  %v2195_v14 = vmul.f32 %v2187_v44, %v3247_v32  ;;  %v2179_v27 = vadd.f32 %v2178_v38, %v3228_v7  ;;  %v1976_v20 = vadd.f32 %v1975_v11, %v3228_v7  ;;  %v1819_v16 = vmul.f32 1.442695, %v1817_v4 }
 0x1f2   : > { %v3541_v55 = vpop.eup %2510  ;;  %v1816_v33 = vand.u32 2147483647, %v3525_v36  ;;  %v1992_v61 = vmul.f32 %v1984_v51, %v3247_v32  ;;  %v2188_v62 = vmax.f32 %v2175_v42, 0.0  ;;  %v2199_v25 = vadd.f32 %v2193_v43, %v2191_v52 }
 0x1f3   : > { %v1972_v10 = vadd.f32 %v1971_v50, %v3225_v0  ;;  %v2189_v41 = vmax.f32 %v2179_v27, 0.0  ;;  %v1986_v22 = vmax.f32 %v1976_v20, 0.0  ;;  %vm3548_vm4 = vcmp.lt.f32.partialorder %v1021_v31, 0.0004427343 }
 0x1f4   : > { %v1996_v38 = vadd.f32 %v1990_v58, %v1988_v30  ;;  %v1983_v11 = vmax.f32 %v1966_v54, 0.0  ;;  %v2196_v4 = vmul.f32 %v2188_v62, %v3247_v32  ;;  %v2181_v47 = vadd.f32 %v2180_v49, %v3228_v7 }
 0x1f5   : > { %v3554_v51 = vpop.eup %2512  ;;  %v1618_v52 = vmul.f32 1.442695, %v1615_v40  ;;  %v2208_v43 = vadd.f32 %v2194_v46, %v2192_v17  ;;  %v2200_v0 = vadd.f32 %v2199_v25, %v2195_v14  ;;  %v2197_v50 = vmul.f32 %v2189_v41, %v3261_v37 }
 0x1f6   : > { %v1997_v42 = vadd.f32 %v1996_v38, %v1992_v61  ;;  %v1994_v39 = vmul.f32 %v1986_v22, %v3261_v37  ;;  %v2190_v31 = vmax.f32 %v2181_v47, 0.0  ;;  %v1978_v27 = vadd.f32 %v1977_v45, %v3228_v7 }
 0x1f7   : > { %v1223_v30 = vadd.f32 1.0, %v3541_v55  ;;  %2518 = vpow2.f32 %v1819_v16  ;;  %v1981_v58 = vmax.f32 %v3522_v21, 0.0  ;;  %v1985_v54 = vmax.f32 %v1972_v10, 0.0 }
 0x1f8   : > { %v2209_v20 = vadd.f32 %v2208_v43, %v2196_v4  ;;  %v2201_v49 = vadd.f32 %v2200_v0, %v2197_v50  ;;  %v1998_v62 = vadd.f32 %v1997_v42, %v1994_v39  ;;  %v2198_v17 = vmul.f32 %v2190_v31, %v3261_v37 }
 0x1f9   : > { %v1217_v46 = vmul.f32 -0.5, %v3484_v23  ;;  %v1818_v41 = vsub.f32 0.0, %v1816_v33  ;;  %2520 = vpow2.f32 %v1618_v52  ;;  %v1991_v40 = vmul.f32 %v1983_v11, %v3241_v28  ;;  %v2515_v47 = vpop.eup %2514 }
 0x1fa   : > { %v2202_v14 = vrot.slane %v2201_v49, 4  ;;  %v1999_v7 = vrot.slane %v1998_v62, 4  ;;  %v2210_v45 = vadd.f32 %v2209_v20, %v2198_v17  ;;  %v1987_v61 = vmax.f32 %v1978_v27, 0.0 }
 0x1fb   : > { %v1038_v21 = vsub.f32 %v3478_v8, %v3504_v5  ;;  %v1044_v16 = vsub.f32 %v3482_v59, %v3504_v5  ;;  %v1989_v25 = vmul.f32 %v1981_v58, %v3233_v34  ;;  %v1993_v10 = vmul.f32 %v1985_v54, %v3247_v32  ;;  %v3570_v22 = vpop.eup %2516 }
 0x1fc   : > { %v1426_v33 = vadd.f32 1.0, %v3536_v63  ;;  %2522 = vlog2.f32 %v1223_v30  ;;  %v2203_v28 = vadd.f32 %v2202_v14, %v2201_v49  ;;  %v2000_v38 = vadd.f32 %v1999_v7, %v1998_v62 }
 0x1fd   : > { %v1023_v11 = vsel %vm3548_vm4, %v3469_v15, %v3516_v56  ;;  %v2005_v8 = vadd.f32 %v1991_v40, %v1989_v25  ;;  %v2211_v4 = vrot.slane %v2210_v45, 4  ;;  %v1995_v59 = vmul.f32 %v1987_v61, %v3261_v37 }
 0x1fe   : > { %v3918_v34 = vsel %vm3464_vm3, %v3462_v3, %v3499_v2  ;;  %v1218_v52 = vadd.f32 1.0, %v1217_v46  ;;  %v1220_v43 = vand.u32 2147483647, %v3484_v23  ;;  %v1821_v0 = vmul.f32 1.442695, %v1818_v41 }
 0x1ff   : > { %v862_v32 = vadd.f32 %v3918_v34, %v834_v29  ;;  %v1041_v50 = vmul.f32 1.442695, %v1038_v21  ;;  %v2006_v42 = vadd.f32 %v2005_v8, %v1993_v10  ;;  %v2204_v44 = vrot.slane %v2203_v28, 2 }
 0x200   : > { %v2001_v15 = vrot.slane %v2000_v38, 2  ;;  %v3919_v56 = vmax.f32 %v3344_v1, 0.0  ;;  %v1216_v37 = vmul.f32 0.6931472, %v2515_v47  ;;  %2524 = vlog2.f32 %v1426_v33 }
 0x201   : > { %v1620_v13 = vadd.f32 1.0, %v3570_v22  ;;  %v2205_v18 = vadd.f32 %v2204_v44, %v2203_v28  ;;  %v2212_v3 = vadd.f32 %v2211_v4, %v2210_v45  ;;  %v2007_v29 = vadd.f32 %v2006_v42, %v1995_v59 }
 0x202   : > { %v3588_v39 = vadd.f32 %v1023_v11, %v3919_v56  ;;  %v2002_v31 = vadd.f32 %v2001_v15, %v2000_v38  ;;  %v1219_v27 = vmul.f32 %v3484_v23, %v1218_v52  ;;  %vm3595_vm5 = vcmp.lt.f32.partialorder %v1220_v43, 0.0004427343 }
 0x203   : > { %2526 = vpow2.f32 %v1821_v0  ;;  %v2206_v1 = vrot.slane %v2205_v18, 1  ;;  %v2213_v54 = vrot.slane %v2212_v3, 2  ;;  %v2008_v20 = vrot.slane %v2007_v29, 4 }
 0x204   : > { %v3592_v2 = vmax.f32 %v862_v32, %v3588_v39  ;;  %v2003_v58 = vrot.slane %v2002_v31, 1  ;;  %v3599_v49 = vpop.eup %2518  ;;  %v3922_v62 = vand.u32 2147483647, %v3451_v12  ;;  %v1222_v23 = vsel %vm3595_vm5, %v1219_v27, %v1216_v37 }
 0x205   : > { %v1429_v46 = vmul.f32 -0.5, %v3536_v63  ;;  %2528 = vlog2.f32 %v1620_v13  ;;  %v2207_v41 = vadd.f32 %v2206_v1, %v2205_v18  ;;  %v2214_v47 = vadd.f32 %v2213_v54, %v2212_v3 }
 0x206   : > { %vm3603_vm6 = vcmp.lt.f32.partialorder %v3922_v62, 0.0004427343  ;;  %v2004_v40 = vadd.f32 %v2003_v58, %v2002_v31  ;;  %v2009_v14 = vadd.f32 %v2008_v20, %v2007_v29  ;;  %v3610_v7 = vpop.eup %2520  ;;  %v1047_v45 = vmul.f32 1.442695, %v1044_v16 }
 0x207   : > { %v1422_v61 = vmul.f32 %v3451_v12, %v3497_v6  ;;  %v1037_v21 = vsub.f32 %v862_v32, %v3592_v2  ;;  %v1226_v25 = vmul.f32 -0.5, %v3541_v55  ;;  %2530 = vpow2.f32 %v1041_v50 }
 0x208   : > { %v3617_v10 = vadd.f32 %v2207_v41, %v3304_v48  ;;  %v3620_v33 = vadd.f32 %v2004_v40, %v3304_v48  ;;  %v2215_v28 = vrot.slane %v2214_v47, 1  ;;  %v1419_v38 = vmul.f32 0.6931472, %v3554_v51 }
 0x209   : > { %v3925_v11 = vmax.f32 %v3392_v24, 0.0  ;;  %v1432_v8 = vand.u32 2147483647, %v3536_v63  ;;  %v2010_v12 = vrot.slane %v2009_v14, 2  ;;  %v2523_v6 = vpop.eup %2522  ;;  %v1043_v4 = vsub.f32 %v3588_v39, %v3592_v2 }
 0x20a   : > { %v1430_v59 = vadd.f32 1.0, %v1429_v46  ;;  %v1823_v34 = vadd.f32 1.0, %v3599_v49  ;;  %v2221_v32 = vand.u32 2147483647, %v3617_v10  ;;  %v1039_v52 = vmul.f32 1.442695, %v1037_v21 }
 0x20b   : > { %v1232_v16 = vadd.f32 %v1222_v23, %v3925_v11  ;;  %v1227_v43 = vadd.f32 1.0, %v1226_v25  ;;  %v1629_v0 = vadd.f32 1.0, %v3610_v7  ;;  %v2018_v51 = vand.u32 2147483647, %v3620_v33 }
 0x20c   : > { %v1229_v24 = vand.u32 2147483647, %v3541_v55  ;;  %v2223_v50 = vsub.f32 0.0, %v2221_v32  ;;  %v2216_v42 = vadd.f32 %v2215_v28, %v2214_v47  ;;  %v2011_v44 = vadd.f32 %v2010_v12, %v2009_v14 }
 0x20d   : > { %v1425_v15 = vsel %vm3603_vm6, %v1422_v61, %v1419_v38  ;;  %v3636_v56 = vmax.f32 %v3592_v2, %v1232_v16  ;;  %v1225_v39 = vmul.f32 0.6931472, %v2523_v6  ;;  %v2020_v37 = vsub.f32 0.0, %v2018_v51  ;;  %v2525_v13 = vpop.eup %2524 }
 0x20e   : > { %2532 = vlog2.f32 %v1823_v34  ;;  %v2225_v18 = vmul.f32 1.442695, %v2223_v50  ;;  %v3639_v31 = vadd.f32 %v2216_v42, %v3304_v48  ;;  %v2012_v3 = vrot.slane %v2011_v44, 1 }
 0x20f   : > { %v1228_v29 = vmul.f32 %v3541_v55, %v1227_v43  ;;  %v1623_v27 = vmul.f32 -0.5, %v3570_v22  ;;  %2534 = vlog2.f32 %v1629_v0  ;;  %v2022_v30 = vmul.f32 1.442695, %v2020_v37 }
 0x210   : > { %v3643_v1 = vpop.eup %2526  ;;  %vm3645_vm7 = vcmp.lt.f32.partialorder %v1229_v24, 0.0004427343  ;;  %2536 = vpow2.f32 %v2225_v18  ;;  %v2222_v54 = vand.u32 2147483647, %v3639_v31  ;;  %v2013_v20 = vadd.f32 %v2012_v3, %v2011_v44 }
 0x211   : > { %v3928_v62 = vmax.f32 %v3372_v35, 0.0  ;;  %v1236_v55 = vsub.f32 %v3592_v2, %v3636_v56  ;;  %v1231_v23 = vsel %vm3645_vm7, %v1228_v29, %v1225_v39  ;;  %2538 = vpow2.f32 %v2022_v30 }
 0x212   : > { %v2529_v46 = vpop.eup %2528  ;;  %2540 = vpow2.f32 %v1039_v52  ;;  %v1045_v41 = vmul.f32 1.442695, %v1043_v4  ;;  %v2224_v40 = vsub.f32 0.0, %v2222_v54  ;;  %v3659_v47 = vadd.f32 %v2013_v20, %v3304_v48 }
 0x213   : > { %v3652_v17 = vadd.f32 %v1425_v15, %v3928_v62  ;;  %v1242_v14 = vsub.f32 %v1232_v16, %v3636_v56  ;;  %v1428_v61 = vmul.f32 0.6931472, %v2525_v13  ;;  %v1624_v21 = vadd.f32 1.0, %v1623_v27 }
 0x214   : > { %v3929_v2 = vmax.f32 %v3413_v9, 0.0  ;;  %v1626_v28 = vand.u32 2147483647, %v3570_v22  ;;  %v2227_v38 = vmul.f32 1.442695, %v2224_v40  ;;  %v3670_v12 = vpop.eup %2530  ;;  %2542 = vpow2.f32 %v1047_v45 }
 0x215   : > { %v3664_v35 = vmax.f32 %v3636_v56, %v3652_v17  ;;  %v2019_v11 = vand.u32 2147483647, %v3659_v47  ;;  %v1238_v48 = vmul.f32 1.442695, %v1236_v55  ;;  %v1408_v16 = vmax.f32 %v3410_v57, 0.0 }
 0x216   : > { %v1233_v25 = vadd.f32 %v1231_v23, %v3929_v2  ;;  %v1622_v6 = vmul.f32 0.6931472, %v2529_v46  ;;  %v1431_v4 = vmul.f32 %v3536_v63, %v1430_v59  ;;  %vm3674_vm8 = vcmp.lt.f32.partialorder %v1432_v8, 0.0004427343 }
 0x217   : > { %v1832_v9 = vadd.f32 1.0, %v3643_v1  ;;  %2544 = vpow2.f32 %v2227_v38  ;;  %v1244_v32 = vmul.f32 1.442695, %v1242_v14  ;;  %v1625_v52 = vmul.f32 %v3570_v22, %v1624_v21 }
 0x218   : > { %2546 = vpow2.f32 %v1045_v41  ;;  %v2021_v43 = vsub.f32 0.0, %v2019_v11  ;;  %v1439_v45 = vsub.f32 %v3636_v56, %v3664_v35  ;;  %v1434_v57 = vsel %vm3674_vm8, %v1431_v4, %v1428_v61 }
 0x219   : > { %v1235_v63 = vmax.f32 %v3504_v5, %v1233_v25  ;;  %vm3685_vm9 = vcmp.lt.f32.partialorder %v1626_v28, 0.0004427343  ;;  %2548 = vpow2.f32 %v1238_v48  ;;  %v1826_v59 = vmul.f32 -0.5, %v3599_v49 }
 0x21a   : > { %v1628_v0 = vsel %vm3685_vm9, %v1625_v52, %v1622_v6  ;;  %v1632_v22 = vmul.f32 -0.5, %v3610_v7  ;;  %v1610_v51 = vmax.f32 %v3443_v26, 0.0  ;;  %2550 = vlog2.f32 %v1832_v9 }
 0x21b   : > { %v2024_v24 = vmul.f32 1.442695, %v2021_v43  ;;  %v2533_v50 = vpop.eup %2532  ;;  %v1052_v42 = vmul.f32 0.5, %v3670_v12  ;;  %2552 = vpow2.f32 %v1244_v32  ;;  %v3695_v44 = vadd.f32 %v1434_v57, %v1408_v16 }
 0x21c   : > { %v2535_v15 = vpop.eup %2534  ;;  %v1445_v56 = vsub.f32 %v3652_v17, %v3664_v35  ;;  %v1237_v39 = vsub.f32 %v3504_v5, %v1235_v63  ;;  %v1243_v37 = vsub.f32 %v1233_v25, %v1235_v63  ;;  %v1638_v13 = vadd.f32 %v1628_v0, %v1610_v51 }
 0x21d   : > { %v3700_v18 = vpop.eup %2536  ;;  %v1441_v3 = vmul.f32 1.442695, %v1439_v45  ;;  %v3703_v26 = vmax.f32 %v1235_v63, %v3695_v44  ;;  %v1827_v29 = vadd.f32 1.0, %v1826_v59  ;;  %v1633_v27 = vadd.f32 1.0, %v1632_v22 }
 0x21e   : > { %v3705_v30 = vpop.eup %2538  ;;  %v1829_v58 = vand.u32 2147483647, %v3599_v49  ;;  %v1635_v54 = vand.u32 2147483647, %v3610_v7  ;;  %v2229_v20 = vadd.f32 1.0, %v3700_v18  ;;  %2554 = vpow2.f32 %v2024_v24 }
 0x21f   : > { %v3710_v5 = vpop.eup %2540  ;;  %v1813_v62 = vmax.f32 %v3487_v53, 0.0  ;;  %v1825_v17 = vmul.f32 0.6931472, %v2533_v50  ;;  %v1631_v55 = vmul.f32 0.6931472, %v2535_v15  ;;  %v2026_v23 = vadd.f32 1.0, %v3705_v30 }
 0x220   : > { %v1240_v46 = vmul.f32 1.442695, %v1237_v39  ;;  %v1246_v41 = vmul.f32 1.442695, %v1243_v37  ;;  %v3715_v40 = vmax.f32 %v3664_v35, %v1638_v13  ;;  %2556 = vlog2.f32 %v2229_v20 }
 0x221   : > { %v1440_v14 = vsub.f32 %v1235_v63, %v3703_v26  ;;  %v1828_v61 = vmul.f32 %v3599_v49, %v1827_v29  ;;  %v1634_v21 = vmul.f32 %v3610_v7, %v1633_v27  ;;  %2558 = vlog2.f32 %v2026_v23  ;;  %v3720_v2 = vpop.eup %2542 }
 0x222   : > { %v1447_v53 = vmul.f32 1.442695, %v1445_v56  ;;  %vm3722_vm10 = vcmp.lt.f32.partialorder %v1829_v58, 0.0004427343  ;;  %vm3726_vm11 = vcmp.lt.f32.partialorder %v1635_v54, 0.0004427343  ;;  %2560 = vpow2.f32 %v1441_v3 }
 0x223   : > { %v1831_v49 = vsel %vm3722_vm10, %v1828_v61, %v1825_v17  ;;  %v1835_v7 = vmul.f32 -0.5, %v3643_v1  ;;  %v1637_v11 = vsel %vm3726_vm11, %v1634_v21, %v1631_v55  ;;  %v1051_v16 = vmul.f32 0.5, %v3710_v5 }
 0x224   : > { %v3730_v38 = vpop.eup %2544  ;;  %2562 = vpow2.f32 %v1240_v46  ;;  %v1642_v6 = vsub.f32 %v3664_v35, %v3715_v40  ;;  %v1611_v4 = vmax.f32 %v3508_v60, 0.0  ;;  %v1443_v34 = vmul.f32 1.442695, %v1440_v14 }
 0x225   : > { %v3737_v48 = vpop.eup %2546  ;;  %2564 = vpow2.f32 %v1246_v41  ;;  %v1648_v9 = vsub.f32 %v1638_v13, %v3715_v40  ;;  %v1446_v52 = vsub.f32 %v3695_v44, %v3703_v26  ;;  %v1841_v43 = vadd.f32 %v1831_v49, %v1813_v62 }
 0x226   : > { %v3744_v32 = vpop.eup %2548  ;;  %v1639_v45 = vadd.f32 %v1637_v11, %v1611_v4  ;;  %v2238_v57 = vadd.f32 1.0, %v3730_v38  ;;  %v3750_v8 = vadd.f32 %v3720_v2, %v1052_v42  ;;  %2566 = vpow2.f32 %v1447_v53 }
 0x227   : > { %v2551_v63 = vpop.eup %2550  ;;  %v1836_v35 = vadd.f32 1.0, %v1835_v7  ;;  %v2029_v60 = vmul.f32 -0.5, %v3705_v30  ;;  %v1053_v0 = vadd.f32 %v3737_v48, %v1051_v16  ;;  %v1644_v22 = vmul.f32 1.442695, %v1642_v6 }
 0x228   : > { %v3753_v59 = vpop.eup %2552  ;;  %v3757_v51 = vmax.f32 %v3715_v40, %v1841_v43  ;;  %v1814_v24 = vmax.f32 %v3525_v36, 0.0  ;;  %2568 = vpow2.f32 %v1443_v34  ;;  %v1650_v50 = vmul.f32 1.442695, %v1648_v9 }
 0x229   : > { %v1838_v44 = vand.u32 2147483647, %v3643_v1  ;;  %v2232_v42 = vmul.f32 -0.5, %v3700_v18  ;;  %v1449_v15 = vmul.f32 1.442695, %v1446_v52  ;;  %v3763_v39 = vmax.f32 %v3703_v26, %v1639_v45 }
 0x22a   : > { %v1834_v56 = vmul.f32 0.6931472, %v2551_v63  ;;  %2570 = vlog2.f32 %v2238_v57  ;;  %v1252_v13 = vmul.f32 %v3744_v32, %v1053_v0  ;;  %v1254_v3 = vmul.f32 1.5, %v3753_v59 }
 0x22b   : > { %v3765_v37 = vpop.eup %2554  ;;  %v1837_v36 = vmul.f32 %v3643_v1, %v1836_v35  ;;  %v2030_v29 = vadd.f32 1.0, %v2029_v60  ;;  %2572 = vpow2.f32 %v1644_v22  ;;  %v1845_v27 = vsub.f32 %v3715_v40, %v3757_v51 }
 0x22c   : > { %v2032_v58 = vand.u32 2147483647, %v3705_v30  ;;  %v2035_v54 = vadd.f32 1.0, %v3765_v37  ;;  %2574 = vpow2.f32 %v1650_v50  ;;  %v1851_v62 = vsub.f32 %v1841_v43, %v3757_v51 }
 0x22d   : > { %v2557_v20 = vpop.eup %2556  ;;  %vm3775_vm12 = vcmp.lt.f32.partialorder %v1838_v44, 0.0004427343  ;;  %v2233_v55 = vadd.f32 1.0, %v2232_v42  ;;  %v1643_v46 = vsub.f32 %v3703_v26, %v3763_v39  ;;  %v2235_v41 = vand.u32 2147483647, %v3700_v18 }
 0x22e   : > { %v2559_v23 = vpop.eup %2558  ;;  %v1840_v1 = vsel %vm3775_vm12, %v1837_v36, %v1834_v56  ;;  %2576 = vlog2.f32 %v2035_v54  ;;  %v1649_v40 = vsub.f32 %v1639_v45, %v3763_v39  ;;  %v2231_v14 = vmul.f32 0.6931472, %v2557_v20 }
 0x22f   : > { %v2028_v61 = vmul.f32 0.6931472, %v2559_v23  ;;  %v2031_v21 = vmul.f32 %v3705_v30, %v2030_v29  ;;  %v3786_v53 = vpop.eup %2560  ;;  %v1256_v25 = vadd.f32 %v1254_v3, %v1252_v13  ;;  %v1847_v28 = vmul.f32 1.442695, %v1845_v27 }
 0x230   : > { %v2016_v49 = vmax.f32 %v3620_v33, 0.0  ;;  %vm2033_vm13 = vcmp.lt.f32.partialorder %v2032_v58, 0.0004427343  ;;  %v1853_v11 = vmul.f32 1.442695, %v1851_v62  ;;  %v1842_v26 = vadd.f32 %v1840_v1, %v1814_v24 }
 0x231   : > { %v3789_v7 = vpop.eup %2562  ;;  %v2234_v16 = vmul.f32 %v3700_v18, %v2233_v55  ;;  %v2034_v6 = vsel %vm2033_vm13, %v2031_v21, %v2028_v61  ;;  %2578 = vpow2.f32 %v1449_v15  ;;  %v1646_v34 = vmul.f32 1.442695, %v1643_v46 }
 0x232   : > { %v3792_v4 = vpop.eup %2564  ;;  %vm3794_vm14 = vcmp.lt.f32.partialorder %v2235_v41, 0.0004427343  ;;  %v2044_v9 = vadd.f32 %v2034_v6, %v2016_v49  ;;  %v1652_v52 = vmul.f32 1.442695, %v1649_v40  ;;  %v3799_v33 = vmax.f32 %v3763_v39, %v1842_v26 }
 0x233   : > { %v2237_v43 = vsel %vm3794_vm14, %v2234_v16, %v2231_v14  ;;  %v2241_v45 = vmul.f32 -0.5, %v3730_v38  ;;  %v3804_v18 = vpop.eup %2566  ;;  %2580 = vpow2.f32 %v1847_v28  ;;  %v2219_v57 = vmax.f32 %v3617_v10, 0.0 }
 0x234   : > { %v2046_v63 = vmax.f32 %v3757_v51, %v2044_v9  ;;  %v2038_v35 = vmul.f32 -0.5, %v3765_v37  ;;  %v1455_v60 = vmul.f32 %v3786_v53, %v1256_v25  ;;  %v1253_v0 = vmul.f32 %v3789_v7, %v3750_v8 }
 0x235   : > { %v1255_v22 = vmul.f32 1.5, %v3792_v4  ;;  %2582 = vpow2.f32 %v1853_v11  ;;  %v3813_v24 = vpop.eup %2568  ;;  %v2247_v50 = vadd.f32 %v2237_v43, %v2219_v57  ;;  %v1457_v15 = vmul.f32 2.0, %v3804_v18 }
 0x236   : > { %2584 = vpow2.f32 %v1646_v34  ;;  %v2048_v44 = vsub.f32 %v3757_v51, %v2046_v63  ;;  %v2054_v42 = vsub.f32 %v2044_v9, %v2046_v63  ;;  %v1846_v56 = vsub.f32 %v3763_v39, %v3799_v33 }
 0x237   : > { %v2571_v10 = vpop.eup %2570  ;;  %2586 = vpow2.f32 %v1652_v52  ;;  %v2242_v13 = vadd.f32 1.0, %v2241_v45  ;;  %v2249_v36 = vmax.f32 %v2046_v63, %v2247_v50  ;;  %v2039_v29 = vadd.f32 1.0, %v2038_v35 }
 0x238   : > { %v2050_v3 = vmul.f32 1.442695, %v2048_v44  ;;  %v2056_v8 = vmul.f32 1.442695, %v2054_v42  ;;  %v3819_v27 = vpop.eup %2572  ;;  %v1852_v58 = vsub.f32 %v1842_v26, %v3799_v33  ;;  %v2244_v54 = vand.u32 2147483647, %v3730_v38 }
 0x239   : > { %v2041_v51 = vand.u32 2147483647, %v3765_v37  ;;  %v3824_v20 = vpop.eup %2574  ;;  %v1257_v62 = vadd.f32 %v1255_v22, %v1253_v0  ;;  %v1459_v17 = vadd.f32 %v1457_v15, %v1455_v60  ;;  %v2240_v55 = vmul.f32 0.6931472, %v2571_v10 }
 0x23a   : > { %v1849_v39 = vmul.f32 1.442695, %v1846_v56  ;;  %2588 = vpow2.f32 %v2050_v3  ;;  %v2243_v1 = vmul.f32 %v3730_v38, %v2242_v13  ;;  %v2017_v46 = vmax.f32 %v3659_v47, 0.0 }
 0x23b   : > { %v2577_v23 = vpop.eup %2576  ;;  %2590 = vpow2.f32 %v2056_v8  ;;  %v2251_v41 = vsub.f32 %v2046_v63, %v2249_v36  ;;  %v2040_v14 = vmul.f32 %v3765_v37, %v2039_v29  ;;  %v1658_v61 = vmul.f32 %v3819_v27, %v1459_v17 }
 0x23c   : > { %v2037_v40 = vmul.f32 0.6931472, %v2577_v23  ;;  %v1855_v21 = vmul.f32 1.442695, %v1852_v58  ;;  %vm3830_vm15 = vcmp.lt.f32.partialorder %v2244_v54, 0.0004427343  ;;  %v2257_v49 = vsub.f32 %v2247_v50, %v2249_v36 }
 0x23d   : > { %vm2042_vm0 = vcmp.lt.f32.partialorder %v2041_v51, 0.0004427343  ;;  %v1660_v28 = vmul.f32 2.5, %v3824_v20  ;;  %v2246_v38 = vsel %vm3830_vm15, %v2243_v1, %v2240_v55  ;;  %v1049_v26 = vadd.f32 %v3737_v48, %v3710_v5 }
 0x23e   : > { %v2043_v47 = vsel %vm2042_vm0, %v2040_v14, %v2037_v40  ;;  %v2579_v11 = vpop.eup %2578  ;;  %v2220_v37 = vmax.f32 %v3639_v31, 0.0  ;;  %v1050_v6 = vadd.f32 %v3720_v2, %v3670_v12  ;;  %v1456_v34 = vmul.f32 %v3813_v24, %v1257_v62 }
 0x23f   : > { %v2045_v16 = vadd.f32 %v2043_v47, %v2017_v46  ;;  %2592 = vpow2.f32 %v1849_v39  ;;  %v2253_v30 = vmul.f32 1.442695, %v2251_v41  ;;  %v1248_v52 = vmul.f32 %v3744_v32, %v1049_v26 }
 0x240   : > { %v3843_v9 = vpop.eup %2580  ;;  %2594 = vpow2.f32 %v1855_v21  ;;  %v2248_v43 = vadd.f32 %v2246_v38, %v2220_v37  ;;  %v1249_v31 = vmul.f32 %v3789_v7, %v1050_v6  ;;  %v1662_v5 = vadd.f32 %v1660_v28, %v1658_v61 }
 0x241   : > { %v2047_v45 = vmax.f32 %v3799_v33, %v2045_v16  ;;  %v1458_v48 = vmul.f32 2.0, %v2579_v11  ;;  %v2259_v63 = vmul.f32 1.442695, %v2257_v49  ;;  %2596 = vpow2.f32 %v2253_v30 }
 0x242   : > { %v3847_v57 = vpop.eup %2582  ;;  %v1250_v10 = vadd.f32 %v3753_v59, %v1248_v52  ;;  %v1251_v15 = vadd.f32 %v3792_v4, %v1249_v31  ;;  %v1861_v7 = vmul.f32 %v3843_v9, %v1662_v5 }
 0x243   : > { %v2585_v12 = vpop.eup %2584  ;;  %v2049_v2 = vsub.f32 %v3799_v33, %v2047_v45  ;;  %v2055_v35 = vsub.f32 %v2045_v16, %v2047_v45  ;;  %v2250_v60 = vmax.f32 %v2047_v45, %v2248_v43  ;;  %v1460_v22 = vadd.f32 %v1458_v48, %v1456_v34 }
 0x244   : > { %v2587_v0 = vpop.eup %2586  ;;  %2598 = vpow2.f32 %v2259_v63  ;;  %v1863_v36 = vmul.f32 3.0, %v3847_v57  ;;  %v1451_v58 = vmul.f32 %v3786_v53, %v1250_v10  ;;  %v1452_v54 = vmul.f32 %v3813_v24, %v1251_v15 }
 0x245   : > { %v2052_v32 = vmul.f32 1.442695, %v2049_v2  ;;  %v2058_v50 = vmul.f32 1.442695, %v2055_v35  ;;  %v2252_v44 = vsub.f32 %v2047_v45, %v2250_v60  ;;  %v2258_v42 = vsub.f32 %v2248_v43, %v2250_v60 }
 0x246   : > { %v1659_v56 = vmul.f32 %v2585_v12, %v1460_v22  ;;  %v1661_v13 = vmul.f32 2.5, %v2587_v0  ;;  %v1865_v59 = vadd.f32 %v1863_v36, %v1861_v7  ;;  %v1453_v23 = vadd.f32 %v3804_v18, %v1451_v58 }
 0x247   : > { %2600 = vpow2.f32 %v2052_v32  ;;  %v2261_v33 = vmul.f32 1.442695, %v2258_v42  ;;  %v2589_v3 = vpop.eup %2588  ;;  %v2255_v8 = vmul.f32 1.442695, %v2252_v44  ;;  %v1454_v39 = vadd.f32 %v2579_v11, %v1452_v54 }
 0x248   : > { %2602 = vpow2.f32 %v2058_v50  ;;  %v2591_v29 = vpop.eup %2590  ;;  %v1663_v4 = vadd.f32 %v1661_v13, %v1659_v56  ;;  %v2064_v62 = vmul.f32 %v2589_v3, %v1865_v59  ;;  %v1654_v46 = vmul.f32 %v3819_v27, %v1453_v23 }
 0x249   : > { %2604 = vpow2.f32 %v2261_v33  ;;  %v2066_v51 = vmul.f32 3.5, %v2591_v29  ;;  %v1655_v41 = vmul.f32 %v2585_v12, %v1454_v39  ;;  %v2678_v12 = vmov 1966171168  }
 0x24a   : > { %2606 = vpow2.f32 %v2255_v8  ;;  %v1656_v25 = vadd.f32 %v3824_v20, %v1654_v46  ;;  %v3944_v7 = vlaneseq }
 0x24b   : > { %v2068_v40 = vadd.f32 %v2066_v51, %v2064_v62  ;;  %v1657_v28 = vadd.f32 %v2587_v0, %v1655_v41 }
 0x24c   : > { %v2593_v17 = vpop.eup %2592  ;;  %v1857_v11 = vmul.f32 %v3843_v9, %v1656_v25  ;;  %v2281_v9 = vunpack.c.l.s4 %v2678_v12  ;;  %vm2297_vm1 = vcmp.lt.s32.totalorder %v3944_v7, 256 }
 0x24d   : > { %v2595_v55 = vpop.eup %2594  ;;  %v1862_v1 = vmul.f32 %v2593_v17, %v1663_v4  ;;  %v1858_v16 = vmul.f32 %v2593_v17, %v1657_v28 }
 0x24e   : > { %v2597_v14 = vpop.eup %2596  ;;  %v1864_v53 = vmul.f32 3.0, %v2595_v55  ;;  %v1859_v43 = vadd.f32 %v3847_v57, %v1857_v11  ;;  %v2282_v60 = vunpack.c.0.s8 %v2281_v9 }
 0x24f   : > { %v2267_v49 = vmul.f32 %v2597_v14, %v2068_v40  ;;  %v1860_v45 = vadd.f32 %v2595_v55, %v1858_v16 }
 0x250   : > { %v1866_v24 = vadd.f32 %v1864_v53, %v1862_v1  ;;  %v2060_v31 = vmul.f32 %v2589_v3, %v1859_v43  ;;  %v2285_v42 = vsub.s32 %v2282_v60, %v2822_v19 }
 0x251   : > { %v2599_v61 = vpop.eup %2598 }
 0x252   : > { %v2269_v37 = vmul.f32 4.0, %v2599_v61  ;;  %v2062_v48 = vadd.f32 %v2591_v29, %v2060_v31 }
 0x254   : > { %v2601_v21 = vpop.eup %2600  ;;  %v2271_v6 = vadd.f32 %v2269_v37, %v2267_v49  ;;  %v2263_v2 = vmul.f32 %v2597_v14, %v2062_v48 }
 0x255   : > { %v2603_v38 = vpop.eup %2602  ;;  %v2065_v47 = vmul.f32 %v2601_v21, %v1866_v24  ;;  %v2061_v5 = vmul.f32 %v2601_v21, %v1860_v45 }
 0x256   : > { %v2067_v26 = vmul.f32 3.5, %v2603_v38  ;;  %v2605_v18 = vpop.eup %2604  ;;  %2608 = vrcp.f32 %v2271_v6  ;;  %v2265_v22 = vadd.f32 %v2599_v61, %v2263_v2 }
 0x257   : > { %v2607_v34 = vpop.eup %2606  ;;  %v2270_v52 = vmul.f32 4.0, %v2605_v18  ;;  %v2063_v63 = vadd.f32 %v2603_v38, %v2061_v5 }
 0x258   : > { %v2069_v27 = vadd.f32 %v2067_v26, %v2065_v47 }
 0x259   : > { %v2264_v35 = vmul.f32 %v2607_v34, %v2063_v63 }
 0x25a   : > { %v2268_v30 = vmul.f32 %v2607_v34, %v2069_v27 }
 0x25b   : > { %v2266_v32 = vadd.f32 %v2605_v18, %v2264_v35 }
 0x25c   : > { %v2272_v20 = vadd.f32 %v2270_v52, %v2268_v30 }
 0x25e   : > { %2610 = vrcp.f32 %v2272_v20 }
 0x263   : > { %v2609_v0 = vpop.eup %2608 }
 0x264   : > { %v2275_v50 = vmul.f32 %v2609_v0, %v2265_v22 }
 0x26b   : > { %v2611_v57 = vpop.eup %2610 }
 0x26c   : > { %v2276_v44 = vmul.f32 %v2611_v57, %v2266_v32 }
 0x26e   : > { %v2279_v10 = vcombine.low %v2275_v50, %v2276_v44 }
 0x270   : > { %v2286_v15 = vrot.slane %v2279_v10, %v2285_v42 }
 0x272   : > { %v2293_v56 = vrot.slane %v2286_v15, %v2285_v42 }
 0x274   : > { %2299 = vst.msk [vmem:[%s316_s28] sm:$0x3] %vm2297_vm1, %v2293_v56 }
 0x275   : > { %2625 = shalt.err (!%p2622_p3)
}
 0x276   : > { %s2626_s23 = scalar_lea.hbm %s2313_s18, 32  ;;  %s2630_s26 = scalar_lea.hbm %s3906_s8, 64 }
 0x277   : > { %p2627_p4 = scmp.ne.s32.totalorder %s2313_s18, %s2626_s23  ;;  %p2631_p9 = scmp.lt.s32.totalorder %s2313_s18, %s3906_s8 }
 0x278   : > { %p2632_p10 = scmp.lt.s32.totalorder %s2630_s26, %s2626_s23 }
 0x279   : > { %p2628_p7 = pnand %p2627_p4, %p2766_p5 }
 0x27a   : > { %p2633_p11 = por %p2632_p10, %p2631_p9 }
 0x27b   : > { %p2629_p8 = pneg %p2628_p7 }
 0x27d   : > { %p2634_p12 = pnand %p2633_p11, %p2629_p8 }
 0x27f   : > { %2637 = shalt.err (!%p2634_p12)
}
 0x280   : > { %2433 = dma.vmem_to_hbm [thread:$0]  (%p2766_p5), %s2316_s11, 32, %s2313_s18, %s2301_s19  }
 0x281 PF: > { %p2439_p13 = scmp.ge.s32.totalorder %s2672_s10, 2  ;;  %s2327_s13 = sand.u32 1, %s2660_s29  }
 0x282   : > { %s2328_s14 = scalar_lea.sflag [#allocation4], %s2327_s13 }
 0x283   : > { %p2436_p0 = pnand %p2439_p13, %p2770_p6 }
 0x285   : > { %p2437_p1 = pneg %p2436_p0 }
 0x287   : > { %2655 = dma.done.wait (%p2437_p1), %s2328_s14, 32  }
 0x288   : > { %2657 = vsyncadd (%p2437_p1), %s2328_s14, 4294967264  ;;  %p19_p2 = scmp.ge.s32.totalorder %s2753_s12, 4   ;;  %s3945_s29 = smov %s2664_s30 }
 0x289   : > { %s3946_s30 = smov %s2668_s9  ;;  %s3947_s9 = smov %s2764_s15 }
 0x28a   : > { %s3948_s10 = smov %s2753_s12  ;;  %21 = sbr.rel (!%p19_p2) target bundleno = 5 (0x5), region = 90 }
 0x28f   :  { %2333 = vsyncpa [#allocation4], 1 }
 0x290   :  { %2335 = vsyncpa [#allocation4 + $0x1], 1 }

</bundles_post_ra>
